<compile_context>
chip_gen: v7x
topology: tpu7x:2x2x1
jax: 0.10.0
libtpu: 0.0.40
codegen_flags: <defaults>
</compile_context>

<pallas_src>
import functools

import jax
import jax.numpy as jnp
from jax.experimental import pallas as pl
from jax.experimental.pallas import tpu as pltpu

EPS = 1e-5                              # PyTorch BatchNorm1d default eps
VMEM_LIMIT_BYTES = 48 * 1024 * 1024     # above default scoped limit, below v7x physical


def _pick_tile(target, total, mult=8):
    """Largest multiple of `mult` that divides `total` and is <= target (else `total`)."""
    t = min(target, total)
    t -= t % mult
    while t >= mult:
        if total % t == 0:
            return t
        t -= mult
    # TODO(synk): pad ragged M/N (with stat masking) instead of a single full tile.
    return total


def _bn_scale_shift(parts, p, m):
    """Finalize BN: per-tile (..., 2, C) partials -> fused per-channel scale/shift (2, C)."""
    tot = jnp.sum(parts, axis=0)                        # (2, C)
    mean = tot[0] / m
    var = jnp.maximum(tot[1] / m - mean * mean, 0.0)    # biased var (training-mode BN)
    scale = p[1] * jax.lax.rsqrt(var + EPS)             # gamma / sqrt(var + eps)
    shift = p[2] - mean * scale                         # beta - mean * scale
    return jnp.stack([scale, shift]).astype(jnp.float32)


# ---------------------------------------------------------------------------
# Fused conv1 (+BN1 folded) + ReLU + conv2 kernel.
# y1 never materializes in HBM; BN2 partial stats are emitted per row tile.
# ---------------------------------------------------------------------------
def _fused12_kernel(x_ref, w1e_ref, w2_ref, p2_ref, y2_ref, part_ref):
    x = x_ref[...].astype(jnp.float32)                          # (TM, F)
    w1e = w1e_ref[...]                                          # (F+1, C1): rows 0..F-1 = W1*scale1, row F = bias_eff
    f = x.shape[1]

    # Tiny-K (K = F) contraction on the VPU: broadcast-FMAs keep the MXU free.
    h1 = x[:, 0:1] * w1e[0:1, :] + w1e[f:f + 1, :]
    for k in range(1, f):                                       # static, F is small
        h1 = h1 + x[:, k:k + 1] * w1e[k:k + 1, :]
    h1 = jnp.maximum(h1, 0.0)                                   # BN1 already folded in

    # conv2 on the MXU, f32 accumulation.
    y2 = jnp.dot(h1.astype(jnp.bfloat16), w2_ref[...],
                 preferred_element_type=jnp.float32) + p2_ref[0:1, :]

    # per-tile BN2 partials (finalized wrapper-side): direct row stores.
    part_ref[0, 0:1, :] = jnp.sum(y2, axis=0, keepdims=True)
    part_ref[0, 1:2, :] = jnp.sum(y2 * y2, axis=0, keepdims=True)

    y2_ref[...] = y2.astype(y2_ref.dtype)                       # pre-activation, bf16


def _fused12(x2d, w1e, w2, p2, *, tm):
    m, f = x2d.shape
    c1, c2 = w2.shape
    assert m % tm == 0
    n_tiles = m // tm

    return pl.pallas_call(
        _fused12_kernel,
        out_shape=(jax.ShapeDtypeStruct((m, c2), jnp.bfloat16),
                   jax.ShapeDtypeStruct((n_tiles, 2, c2), jnp.float32)),
        grid_spec=pltpu.PrefetchScalarGridSpec(
            num_scalar_prefetch=0,
            grid=(n_tiles,),
            in_specs=[pl.BlockSpec((tm, f), lambda i: (i, 0)),
                      pl.BlockSpec(w1e.shape, lambda i: (0, 0)),
                      pl.BlockSpec((c1, c2), lambda i: (0, 0)),
                      pl.BlockSpec((3, c2), lambda i: (0, 0))],
            out_specs=(pl.BlockSpec((tm, c2), lambda i: (i, 0)),
                       pl.BlockSpec((1, 2, c2), lambda i: (i, 0, 0)))),
        compiler_params=pltpu.CompilerParams(
            dimension_semantics=("parallel",),      # no cross-tile state -> megacore OK
            vmem_limit_bytes=VMEM_LIMIT_BYTES),
    )(x2d, w1e, w2, p2)


# ---------------------------------------------------------------------------
# Conv block 3 with fused max-pool partials:
# BN2+ReLU prologue -> 128->512 MXU matmul -> per-(batch,channel)
# [sum, sum^2, max, min] of pre-BN y3 accumulated over the N-tile axis.
# The (M,512) y3 activation never round-trips HBM.
# ---------------------------------------------------------------------------
def _conv3_pool_kernel(y2_ref, ss2_ref, w3_ref, p3_ref, stat_ref):
    j = pl.program_id(1)

    h2 = y2_ref[...].astype(jnp.float32)                        # (TN, C2)
    h2 = jnp.maximum(h2 * ss2_ref[0:1, :] + ss2_ref[1:2, :], 0.0)
    y3 = jnp.dot(h2.astype(jnp.bfloat16), w3_ref[...],
                 preferred_element_type=jnp.float32) + p3_ref[0:1, :]   # (TN, C3)

    s1 = jnp.sum(y3, axis=0, keepdims=True)                     # (1, C3)
    s2 = jnp.sum(y3 * y3, axis=0, keepdims=True)
    mx = jnp.max(y3, axis=0, keepdims=True)
    mn = jnp.min(y3, axis=0, keepdims=True)

    @pl.when(j == 0)
    def _():
        stat_ref[0, 0:1, :] = s1
        stat_ref[0, 1:2, :] = s2
        stat_ref[0, 2:3, :] = mx
        stat_ref[0, 3:4, :] = mn

    @pl.when(j > 0)
    def _():
        stat_ref[0, 0:1, :] = stat_ref[0, 0:1, :] + s1
        stat_ref[0, 1:2, :] = stat_ref[0, 1:2, :] + s2
        stat_ref[0, 2:3, :] = jnp.maximum(stat_ref[0, 2:3, :], mx)
        stat_ref[0, 3:4, :] = jnp.minimum(stat_ref[0, 3:4, :], mn)


def _conv3_pool(y2, ss2, w3, p3, *, batch, tn):
    m, c2 = y2.shape
    n = m // batch
    c3 = w3.shape[1]
    assert n % tn == 0
    nj = n // tn

    return pl.pallas_call(
        _conv3_pool_kernel,
        out_shape=jax.ShapeDtypeStruct((batch, 4, c3), jnp.float32),
        grid_spec=pltpu.PrefetchScalarGridSpec(
            num_scalar_prefetch=0,
            grid=(batch, nj),                       # row tiles never straddle a batch
            in_specs=[pl.BlockSpec((tn, c2), lambda b, j: (b * nj + j, 0)),
                      pl.BlockSpec((2, c2), lambda b, j: (0, 0)),
                      pl.BlockSpec((c2, c3), lambda b, j: (0, 0)),
                      pl.BlockSpec((3, c3), lambda b, j: (0, 0))],
            out_specs=pl.BlockSpec((1, 4, c3), lambda b, j: (b, 0, 0))),
        compiler_params=pltpu.CompilerParams(
            dimension_semantics=("parallel", "arbitrary"),   # B megacore-shardable
            vmem_limit_bytes=VMEM_LIMIT_BYTES),
    )(y2, ss2, w3, p3)


# ---------------------------------------------------------------------------
# Tiny head: pooled = relu(where(scale>=0, scale*max, scale*min) + shift)
# -> Linear(512,256)+ReLU -> Linear(256, F^2) + (bias+eye).
# ---------------------------------------------------------------------------
def _fc_head_kernel(mx_ref, mn_ref, ss3_ref, fw1_ref, fb1_ref, fw2_ref, fb2e_ref,
                    o_ref):
    scale = ss3_ref[0:1, :]
    shift = ss3_ref[1:2, :]
    pre = jnp.where(scale >= 0.0, scale * mx_ref[...], scale * mn_ref[...]) + shift
    pooled = jnp.maximum(pre, 0.0).astype(jnp.bfloat16)          # (B, C3)
    h1 = jnp.dot(pooled, fw1_ref[...],
                 preferred_element_type=jnp.float32) + fb1_ref[...]
    h1 = jnp.maximum(h1, 0.0).astype(jnp.bfloat16)
    o_ref[...] = jnp.dot(h1, fw2_ref[...],
                         preferred_element_type=jnp.float32) + fb2e_ref[...]


def _fc_head(mx3, mn3, ss3, fw1, fb1, fw2, fb2eye):
    bsz = mx3.shape[0]
    ff = fw2.shape[1]
    in_specs = [pl.BlockSpec(mx3.shape, lambda i: (0, 0)),
                pl.BlockSpec(mn3.shape, lambda i: (0, 0)),
                pl.BlockSpec(ss3.shape, lambda i: (0, 0)),
                pl.BlockSpec(fw1.shape, lambda i: (0, 0)),
                pl.BlockSpec(fb1.shape, lambda i: (0, 0)),
                pl.BlockSpec(fw2.shape, lambda i: (0, 0)),
                pl.BlockSpec(fb2eye.shape, lambda i: (0, 0))]
    return pl.pallas_call(
        _fc_head_kernel,
        out_shape=jax.ShapeDtypeStruct((bsz, ff), jnp.float32),
        grid_spec=pltpu.PrefetchScalarGridSpec(
            num_scalar_prefetch=0,
            grid=(1,),
            in_specs=in_specs,
            out_specs=pl.BlockSpec((bsz, ff), lambda i: (0, 0))),
        compiler_params=pltpu.CompilerParams(
            dimension_semantics=("arbitrary",),
            vmem_limit_bytes=VMEM_LIMIT_BYTES),
    )(mx3, mn3, ss3, fw1, fb1, fw2, fb2eye)


# ---------------------------------------------------------------------------
# Full forward
# ---------------------------------------------------------------------------
def simple_transformer(x_bnf, params, *, tm=2048, tn=2048):
    """x_bnf: (B, N, F) channels-last points (transpose of PyTorch's B x F x N).
    Returns (B, F, F) transformation matrices."""
    b, n, f = x_bnf.shape
    m = b * n
    tm_e = _pick_tile(tm, m)
    tn_e = _pick_tile(tn, n)

    (w1, p1), (w2, p2), (w3, p3) = params["conv"]
    fw1, fb1, fw2, fb2eye = params["fc"]

    x2d = x_bnf.reshape(m, f).astype(jnp.bfloat16)

    # ---- analytic BN1 stats (K = F is tiny): E[x], E[x x^T] pre-reduction (XLA) ----
    xf = x2d.astype(jnp.float32)
    ex = jnp.mean(xf, axis=0)                                   # (F,)
    exx = (xf.T @ xf) / m                                       # (F, F)
    b1, g1, be1 = p1[0], p1[1], p1[2]
    mean1 = ex @ w1 + b1                                        # (C1,)
    ey1sq = jnp.sum(w1 * (exx @ w1), axis=0) + 2.0 * b1 * (ex @ w1) + b1 * b1
    var1 = jnp.maximum(ey1sq - mean1 * mean1, 0.0)
    scale1 = g1 * jax.lax.rsqrt(var1 + EPS)
    shift1 = be1 - mean1 * scale1
    # Fold BN1 into conv1: relu(scale1*(x@W1+b1)+shift1) = relu(x@W1eff + b1eff).
    w1e = jnp.concatenate(
        [w1 * scale1[None, :], (b1 * scale1 + shift1)[None, :]], axis=0
    ).astype(jnp.float32)                                       # (F+1, C1)

    # ---- fused conv1(+BN1)+ReLU -> conv2; y1 never touches HBM ----
    y2, parts2 = _fused12(x2d, w1e, w2, p2, tm=tm_e)
    ss2 = _bn_scale_shift(parts2, p2, m)

    # ---- conv3 with fused max/min pooling partials; y3 never touches HBM ----
    stats3 = _conv3_pool(y2, ss2, w3, p3, batch=b, tn=tn_e)     # (B, 4, C3)
    ss3 = _bn_scale_shift(stats3[:, 0:2, :], p3, m)
    mx3 = stats3[:, 2, :]
    mn3 = stats3[:, 3, :]

    # ---- pooled finalize + FC head (tiny) ----
    out = _fc_head(mx3, mn3, ss3, fw1, fb1, fw2, fb2eye)
    return out.reshape(b, f, f)


def init_params(key, f, conv_dims=(64, 128, 512), fc_dims=(512, 256)):
    """PyTorch-default-style init.

    conv layer i -> (W_i [Cin,Cout], P_i [3,Cout] f32 = [bias; gamma; beta])
                    (W1 kept f32 for the analytic BN1 / VPU path; W2, W3 bf16)
    fc head      -> (fw1 bf16, fb1 [1,256] f32, fw2 bf16, fb2eye [1, F*F] f32 = bias+eye)
    """
    dims = [f] + list(conv_dims)
    keys = iter(jax.random.split(key, 2 * (len(dims) - 1) + 4))

    conv = []
    for li, (cin, cout) in enumerate(zip(dims[:-1], dims[1:])):
        bound = 1.0 / (cin ** 0.5)
        w = jax.random.uniform(next(keys), (cin, cout), jnp.float32, -bound, bound)
        bias = jax.random.uniform(next(keys), (cout,), jnp.float32, -bound, bound)
        gamma = jnp.ones((cout,), jnp.float32)
        beta = jnp.zeros((cout,), jnp.float32)
        wd = w if li == 0 else w.astype(jnp.bfloat16)
        conv.append((wd, jnp.stack([bias, gamma, beta])))

    d0, d1 = fc_dims
    bound = 1.0 / (d0 ** 0.5)
    fw1 = jax.random.uniform(next(keys), (d0, d1), jnp.float32, -bound, bound)
    fb1 = jax.random.uniform(next(keys), (1, d1), jnp.float32, -bound, bound)
    bound = 1.0 / (d1 ** 0.5)
    fw2 = jax.random.uniform(next(keys), (d1, f * f), jnp.float32, -bound, bound)
    fb2 = jax.random.uniform(next(keys), (1, f * f), jnp.float32, -bound, bound)
    fb2eye = fb2 + jnp.eye(f, dtype=jnp.float32).reshape(1, f * f)   # pre-summed
    return {"conv": conv,
            "fc": (fw1.astype(jnp.bfloat16), fb1, fw2.astype(jnp.bfloat16), fb2eye)}


def _reference(x_bnf, params):
    """Pure-JAX f32 reference (PyTorch training-mode forward semantics)."""
    b, n, f = x_bnf.shape
    h = x_bnf.reshape(b * n, f).astype(jnp.float32)
    for w, p in params["conv"]:
        y = h @ w.astype(jnp.float32) + p[0]
        mean = jnp.mean(y, axis=0)
        var = jnp.mean((y - mean) ** 2, axis=0)
        h = jnp.maximum((y - mean) * (p[1] / jnp.sqrt(var + EPS)) + p[2], 0.0)
    pooled = jnp.max(h.reshape(b, n, -1), axis=1)
    fw1, fb1, fw2, fb2eye = params["fc"]
    h = jnp.maximum(pooled @ fw1.astype(jnp.float32) + fb1, 0.0)
    h = h @ fw2.astype(jnp.float32) + fb2eye
    return h.reshape(b, f, f)


if __name__ == "__main__":
    B, F, N = 2, 4, 128          # input_dimensionality = 4, 128 points per cloud
    key = jax.random.PRNGKey(0)
    kx, kp = jax.random.split(key)

    # Build input in PyTorch layout (B, F, N); kernels consume channels-last (B, N, F).
    x_bfn = jax.random.normal(kx, (B, F, N), dtype=jnp.float32)
    x_bnf = jnp.transpose(x_bfn, (0, 2, 1))

    params = init_params(kp, F)

    run = jax.jit(simple_transformer, static_argnames=("tm", "tn"))
    out = run(x_bnf, params, tm=64, tn=32)   # small tiles -> exercises multi-tile grids
    out = jax.block_until_ready(out)

    ref = _reference(x_bnf, params)
    assert out.shape == (B, F, F)
    err = float(jnp.max(jnp.abs(out - ref)))
    # bf16 matmuls / bf16 intermediate activations vs pure-f32 reference
    assert err < 1e-1, f"max abs error vs reference: {err}"

    print("KERNEL_OK")
</pallas_src>

<mosaic_0001>
module attributes {stable_mosaic.version = 11 : i64} {
  func.func @_fused12_kernel(%arg0: i32, %arg1: memref<64x4xbf16, #tpu.memory_space<vmem>>, %arg2: memref<5x64xf32, #tpu.memory_space<vmem>>, %arg3: memref<64x128xbf16, #tpu.memory_space<vmem>>, %arg4: memref<3x128xf32, #tpu.memory_space<vmem>>, %arg5: memref<64x128xbf16, #tpu.memory_space<vmem>>, %arg6: memref<1x2x128xf32, #tpu.memory_space<vmem>>) attributes {dimension_semantics = [#tpu.dimension_semantics<parallel>], iteration_bounds = array<i64: 4>, scalar_prefetch = 0 : i64, scratch_operands = 0 : i64, tpu.core_type = #tpu.core_type<tc>, window_params = [{transform_indices = @transform_0, window_bounds = array<i64: 64, 4>}, {pipeline_mode = #tpu.pipeline_mode<synchronous>, transform_indices = @transform_1, window_bounds = array<i64: 5, 64>}, {pipeline_mode = #tpu.pipeline_mode<synchronous>, transform_indices = @transform_2, window_bounds = array<i64: 64, 128>}, {pipeline_mode = #tpu.pipeline_mode<synchronous>, transform_indices = @transform_3, window_bounds = array<i64: 3, 128>}, {transform_indices = @transform_4, window_bounds = array<i64: 64, 128>}, {transform_indices = @transform_5, window_bounds = array<i64: 1, 2, 128>}]} {
    %c0 = arith.constant 0 : index
    %c0_0 = arith.constant 0 : index
    %0 = vector.load %arg1[%c0, %c0_0] : memref<64x4xbf16, #tpu.memory_space<vmem>>, vector<64x4xbf16>
    %1 = arith.extf %0 : vector<64x4xbf16> to vector<64x4xf32>
    %c0_1 = arith.constant 0 : index
    %c0_2 = arith.constant 0 : index
    %2 = vector.load %arg2[%c0_1, %c0_2] : memref<5x64xf32, #tpu.memory_space<vmem>>, vector<5x64xf32>
    %3 = vector.extract_strided_slice %1 {offsets = [0, 0], sizes = [64, 1], strides = [1, 1]} : vector<64x4xf32> to vector<64x1xf32>
    %4 = vector.extract_strided_slice %2 {offsets = [0, 0], sizes = [1, 64], strides = [1, 1]} : vector<5x64xf32> to vector<1x64xf32>
    %5 = vector.broadcast %3 : vector<64x1xf32> to vector<64x64xf32>
    %6 = vector.broadcast %4 : vector<1x64xf32> to vector<64x64xf32>
    %7 = arith.mulf %5, %6 : vector<64x64xf32>
    %8 = vector.extract_strided_slice %2 {offsets = [4, 0], sizes = [1, 64], strides = [1, 1]} : vector<5x64xf32> to vector<1x64xf32>
    %9 = vector.broadcast %8 : vector<1x64xf32> to vector<64x64xf32>
    %10 = arith.addf %7, %9 : vector<64x64xf32>
    %11 = vector.extract_strided_slice %1 {offsets = [0, 1], sizes = [64, 1], strides = [1, 1]} : vector<64x4xf32> to vector<64x1xf32>
    %12 = vector.extract_strided_slice %2 {offsets = [1, 0], sizes = [1, 64], strides = [1, 1]} : vector<5x64xf32> to vector<1x64xf32>
    %13 = vector.broadcast %11 : vector<64x1xf32> to vector<64x64xf32>
    %14 = vector.broadcast %12 : vector<1x64xf32> to vector<64x64xf32>
    %15 = arith.mulf %13, %14 : vector<64x64xf32>
    %16 = arith.addf %10, %15 : vector<64x64xf32>
    %17 = vector.extract_strided_slice %1 {offsets = [0, 2], sizes = [64, 1], strides = [1, 1]} : vector<64x4xf32> to vector<64x1xf32>
    %18 = vector.extract_strided_slice %2 {offsets = [2, 0], sizes = [1, 64], strides = [1, 1]} : vector<5x64xf32> to vector<1x64xf32>
    %19 = vector.broadcast %17 : vector<64x1xf32> to vector<64x64xf32>
    %20 = vector.broadcast %18 : vector<1x64xf32> to vector<64x64xf32>
    %21 = arith.mulf %19, %20 : vector<64x64xf32>
    %22 = arith.addf %16, %21 : vector<64x64xf32>
    %23 = vector.extract_strided_slice %1 {offsets = [0, 3], sizes = [64, 1], strides = [1, 1]} : vector<64x4xf32> to vector<64x1xf32>
    %24 = vector.extract_strided_slice %2 {offsets = [3, 0], sizes = [1, 64], strides = [1, 1]} : vector<5x64xf32> to vector<1x64xf32>
    %25 = vector.broadcast %23 : vector<64x1xf32> to vector<64x64xf32>
    %26 = vector.broadcast %24 : vector<1x64xf32> to vector<64x64xf32>
    %27 = arith.mulf %25, %26 : vector<64x64xf32>
    %28 = arith.addf %22, %27 : vector<64x64xf32>
    %cst = arith.constant 0.000000e+00 : f32
    %29 = vector.broadcast %cst : f32 to vector<64x64xf32>
    %30 = arith.maximumf %28, %29 : vector<64x64xf32>
    %31 = arith.truncf %30 : vector<64x64xf32> to vector<64x64xbf16>
    %c0_3 = arith.constant 0 : index
    %c0_4 = arith.constant 0 : index
    %32 = vector.load %arg3[%c0_3, %c0_4] : memref<64x128xbf16, #tpu.memory_space<vmem>>, vector<64x128xbf16>
    %cst_5 = arith.constant dense<0.000000e+00> : vector<64x128xf32>
    %33 = tpu.matmul %31, %32, %cst_5 {dimension_numbers = #tpu.dot_dimension_numbers<[1], [0], [0], [1], [0, 0, 1, 1], [], []>} : vector<64x64xbf16>, vector<64x128xbf16>, vector<64x128xf32> -> vector<64x128xf32>
    %c0_6 = arith.constant 0 : index
    %c0_7 = arith.constant 0 : index
    %34 = vector.load %arg4[%c0_6, %c0_7] : memref<3x128xf32, #tpu.memory_space<vmem>>, vector<1x128xf32>
    %35 = vector.broadcast %34 : vector<1x128xf32> to vector<64x128xf32>
    %36 = arith.addf %33, %35 : vector<64x128xf32>
    %cst_8 = arith.constant dense<0.000000e+00> : vector<128xf32>
    %37 = vector.multi_reduction <add>, %36, %cst_8 [0] : vector<64x128xf32> to vector<128xf32>
    %38 = vector.shape_cast %37 : vector<128xf32> to vector<1x128xf32>
    %c0_9 = arith.constant 0 : index
    %c0_10 = arith.constant 0 : index
    %c0_11 = arith.constant 0 : index
    %39 = vector.load %arg6[%c0_9, %c0_10, %c0_11] : memref<1x2x128xf32, #tpu.memory_space<vmem>>, vector<1x1x128xf32>
    %40 = vector.shape_cast %39 : vector<1x1x128xf32> to vector<1x128xf32>
    %41 = vector.shape_cast %38 : vector<1x128xf32> to vector<1x1x128xf32>
    tpu.vector_store %arg6[%c0_9, %c0_10, %c0_11], %41 {strides = array<i32>} : memref<1x2x128xf32, #tpu.memory_space<vmem>>, vector<1x1x128xf32>,
    %42 = arith.mulf %36, %36 : vector<64x128xf32>
    %cst_12 = arith.constant dense<0.000000e+00> : vector<128xf32>
    %43 = vector.multi_reduction <add>, %42, %cst_12 [0] : vector<64x128xf32> to vector<128xf32>
    %44 = vector.shape_cast %43 : vector<128xf32> to vector<1x128xf32>
    %c0_13 = arith.constant 0 : index
    %c1 = arith.constant 1 : index
    %c0_14 = arith.constant 0 : index
    %45 = vector.load %arg6[%c0_13, %c1, %c0_14] : memref<1x2x128xf32, #tpu.memory_space<vmem>>, vector<1x1x128xf32>
    %46 = vector.shape_cast %45 : vector<1x1x128xf32> to vector<1x128xf32>
    %47 = vector.shape_cast %44 : vector<1x128xf32> to vector<1x1x128xf32>
    tpu.vector_store %arg6[%c0_13, %c1, %c0_14], %47 {strides = array<i32>} : memref<1x2x128xf32, #tpu.memory_space<vmem>>, vector<1x1x128xf32>,
    %48 = arith.truncf %36 : vector<64x128xf32> to vector<64x128xbf16>
    %c0_15 = arith.constant 0 : index
    %c0_16 = arith.constant 0 : index
    %49 = vector.load %arg5[%c0_15, %c0_16] : memref<64x128xbf16, #tpu.memory_space<vmem>>, vector<64x128xbf16>
    tpu.vector_store %arg5[%c0_15, %c0_16], %48 {strides = array<i32>} : memref<64x128xbf16, #tpu.memory_space<vmem>>, vector<64x128xbf16>,
    return
  }
  func.func @transform_0(%arg0: i32) -> (i32, i32) {
    %c0_i32 = arith.constant 0 : i32
    %c0_i32_0 = arith.constant 0 : i32
    return %arg0, %c0_i32 : i32, i32
  }
  func.func @transform_1(%arg0: i32) -> (i32, i32) {
    %c0_i32 = arith.constant 0 : i32
    %c0_i32_0 = arith.constant 0 : i32
    %c0_i32_1 = arith.constant 0 : i32
    return %c0_i32, %c0_i32_0 : i32, i32
  }
  func.func @transform_2(%arg0: i32) -> (i32, i32) {
    %c0_i32 = arith.constant 0 : i32
    %c0_i32_0 = arith.constant 0 : i32
    %c0_i32_1 = arith.constant 0 : i32
    return %c0_i32, %c0_i32_0 : i32, i32
  }
  func.func @transform_3(%arg0: i32) -> (i32, i32) {
    %c0_i32 = arith.constant 0 : i32
    %c0_i32_0 = arith.constant 0 : i32
    %c0_i32_1 = arith.constant 0 : i32
    return %c0_i32, %c0_i32_0 : i32, i32
  }
  func.func @transform_4(%arg0: i32) -> (i32, i32) {
    %c0_i32 = arith.constant 0 : i32
    %c0_i32_0 = arith.constant 0 : i32
    return %arg0, %c0_i32 : i32, i32
  }
  func.func @transform_5(%arg0: i32) -> (i32, i32, i32) {
    %c0_i32 = arith.constant 0 : i32
    %c0_i32_0 = arith.constant 0 : i32
    %c0_i32_1 = arith.constant 0 : i32
    return %arg0, %c0_i32, %c0_i32_0 : i32, i32, i32
  }
}

module attributes {stable_mosaic.version = 11 : i64} {
  func.func @_conv3_pool_kernel(%arg0: i32, %arg1: i32, %arg2: memref<32x128xbf16, #tpu.memory_space<vmem>>, %arg3: memref<2x128xf32, #tpu.memory_space<vmem>>, %arg4: memref<128x512xbf16, #tpu.memory_space<vmem>>, %arg5: memref<3x512xf32, #tpu.memory_space<vmem>>, %arg6: memref<1x4x512xf32, #tpu.memory_space<vmem>>) attributes {dimension_semantics = [#tpu.dimension_semantics<parallel>, #tpu.dimension_semantics<arbitrary>], iteration_bounds = array<i64: 2, 4>, scalar_prefetch = 0 : i64, scratch_operands = 0 : i64, tpu.core_type = #tpu.core_type<tc>, window_params = [{transform_indices = @transform_0, window_bounds = array<i64: 32, 128>}, {pipeline_mode = #tpu.pipeline_mode<synchronous>, transform_indices = @transform_1, window_bounds = array<i64: 2, 128>}, {pipeline_mode = #tpu.pipeline_mode<synchronous>, transform_indices = @transform_2, window_bounds = array<i64: 128, 512>}, {pipeline_mode = #tpu.pipeline_mode<synchronous>, transform_indices = @transform_3, window_bounds = array<i64: 3, 512>}, {transform_indices = @transform_4, window_bounds = array<i64: 1, 4, 512>}]} {
    %c0 = arith.constant 0 : index
    %c0_0 = arith.constant 0 : index
    %0 = vector.load %arg2[%c0, %c0_0] : memref<32x128xbf16, #tpu.memory_space<vmem>>, vector<32x128xbf16>
    %1 = arith.extf %0 : vector<32x128xbf16> to vector<32x128xf32>
    %c0_1 = arith.constant 0 : index
    %c0_2 = arith.constant 0 : index
    %2 = vector.load %arg3[%c0_1, %c0_2] : memref<2x128xf32, #tpu.memory_space<vmem>>, vector<1x128xf32>
    %3 = vector.broadcast %2 : vector<1x128xf32> to vector<32x128xf32>
    %4 = arith.mulf %1, %3 : vector<32x128xf32>
    %c1 = arith.constant 1 : index
    %c0_3 = arith.constant 0 : index
    %5 = vector.load %arg3[%c1, %c0_3] : memref<2x128xf32, #tpu.memory_space<vmem>>, vector<1x128xf32>
    %6 = vector.broadcast %5 : vector<1x128xf32> to vector<32x128xf32>
    %7 = arith.addf %4, %6 : vector<32x128xf32>
    %cst = arith.constant 0.000000e+00 : f32
    %8 = vector.broadcast %cst : f32 to vector<32x128xf32>
    %9 = arith.maximumf %7, %8 : vector<32x128xf32>
    %10 = arith.truncf %9 : vector<32x128xf32> to vector<32x128xbf16>
    %c0_4 = arith.constant 0 : index
    %c0_5 = arith.constant 0 : index
    %11 = vector.load %arg4[%c0_4, %c0_5] : memref<128x512xbf16, #tpu.memory_space<vmem>>, vector<128x512xbf16>
    %cst_6 = arith.constant dense<0.000000e+00> : vector<32x512xf32>
    %12 = tpu.matmul %10, %11, %cst_6 {dimension_numbers = #tpu.dot_dimension_numbers<[1], [0], [0], [1], [0, 0, 1, 1], [], []>} : vector<32x128xbf16>, vector<128x512xbf16>, vector<32x512xf32> -> vector<32x512xf32>
    %c0_7 = arith.constant 0 : index
    %c0_8 = arith.constant 0 : index
    %13 = vector.load %arg5[%c0_7, %c0_8] : memref<3x512xf32, #tpu.memory_space<vmem>>, vector<1x512xf32>
    %14 = vector.broadcast %13 : vector<1x512xf32> to vector<32x512xf32>
    %15 = arith.addf %12, %14 : vector<32x512xf32>
    %cst_9 = arith.constant dense<0.000000e+00> : vector<512xf32>
    %16 = vector.multi_reduction <add>, %15, %cst_9 [0] : vector<32x512xf32> to vector<512xf32>
    %17 = vector.shape_cast %16 : vector<512xf32> to vector<1x512xf32>
    %18 = arith.mulf %15, %15 : vector<32x512xf32>
    %cst_10 = arith.constant dense<0.000000e+00> : vector<512xf32>
    %19 = vector.multi_reduction <add>, %18, %cst_10 [0] : vector<32x512xf32> to vector<512xf32>
    %20 = vector.shape_cast %19 : vector<512xf32> to vector<1x512xf32>
    %cst_11 = arith.constant dense<0xFF800000> : vector<512xf32>
    %21 = vector.multi_reduction <maximumf>, %15, %cst_11 [0] : vector<32x512xf32> to vector<512xf32>
    %22 = vector.shape_cast %21 : vector<512xf32> to vector<1x512xf32>
    %cst_12 = arith.constant dense<0x7F800000> : vector<512xf32>
    %23 = vector.multi_reduction <minimumf>, %15, %cst_12 [0] : vector<32x512xf32> to vector<512xf32>
    %24 = vector.shape_cast %23 : vector<512xf32> to vector<1x512xf32>
    %c0_i32 = arith.constant 0 : i32
    %25 = arith.cmpi eq, %arg1, %c0_i32 : i32
    %26 = arith.extui %25 : i1 to i32
    %c0_i32_13 = arith.constant 0 : i32
    %27 = arith.cmpi ne, %26, %c0_i32_13 : i32
    scf.if %27 {
      %c0_16 = arith.constant 0 : index
      %c0_17 = arith.constant 0 : index
      %c0_18 = arith.constant 0 : index
      %31 = vector.load %arg6[%c0_16, %c0_17, %c0_18] : memref<1x4x512xf32, #tpu.memory_space<vmem>>, vector<1x1x512xf32>
      %32 = vector.shape_cast %31 : vector<1x1x512xf32> to vector<1x512xf32>
      %33 = vector.shape_cast %17 : vector<1x512xf32> to vector<1x1x512xf32>
      tpu.vector_store %arg6[%c0_16, %c0_17, %c0_18], %33 {strides = array<i32>} : memref<1x4x512xf32, #tpu.memory_space<vmem>>, vector<1x1x512xf32>,
      %c0_19 = arith.constant 0 : index
      %c1_20 = arith.constant 1 : index
      %c0_21 = arith.constant 0 : index
      %34 = vector.load %arg6[%c0_19, %c1_20, %c0_21] : memref<1x4x512xf32, #tpu.memory_space<vmem>>, vector<1x1x512xf32>
      %35 = vector.shape_cast %34 : vector<1x1x512xf32> to vector<1x512xf32>
      %36 = vector.shape_cast %20 : vector<1x512xf32> to vector<1x1x512xf32>
      tpu.vector_store %arg6[%c0_19, %c1_20, %c0_21], %36 {strides = array<i32>} : memref<1x4x512xf32, #tpu.memory_space<vmem>>, vector<1x1x512xf32>,
      %c0_22 = arith.constant 0 : index
      %c2 = arith.constant 2 : index
      %c0_23 = arith.constant 0 : index
      %37 = vector.load %arg6[%c0_22, %c2, %c0_23] : memref<1x4x512xf32, #tpu.memory_space<vmem>>, vector<1x1x512xf32>
      %38 = vector.shape_cast %37 : vector<1x1x512xf32> to vector<1x512xf32>
      %39 = vector.shape_cast %22 : vector<1x512xf32> to vector<1x1x512xf32>
      tpu.vector_store %arg6[%c0_22, %c2, %c0_23], %39 {strides = array<i32>} : memref<1x4x512xf32, #tpu.memory_space<vmem>>, vector<1x1x512xf32>,
      %c0_24 = arith.constant 0 : index
      %c3 = arith.constant 3 : index
      %c0_25 = arith.constant 0 : index
      %40 = vector.load %arg6[%c0_24, %c3, %c0_25] : memref<1x4x512xf32, #tpu.memory_space<vmem>>, vector<1x1x512xf32>
      %41 = vector.shape_cast %40 : vector<1x1x512xf32> to vector<1x512xf32>
      %42 = vector.shape_cast %24 : vector<1x512xf32> to vector<1x1x512xf32>
      tpu.vector_store %arg6[%c0_24, %c3, %c0_25], %42 {strides = array<i32>} : memref<1x4x512xf32, #tpu.memory_space<vmem>>, vector<1x1x512xf32>,
    } else {
    }
    %c0_i32_14 = arith.constant 0 : i32
    %28 = arith.cmpi sgt, %arg1, %c0_i32_14 : i32
    %29 = arith.extui %28 : i1 to i32
    %c0_i32_15 = arith.constant 0 : i32
    %30 = arith.cmpi ne, %29, %c0_i32_15 : i32
    scf.if %30 {
      %c0_16 = arith.constant 0 : index
      %c0_17 = arith.constant 0 : index
      %c0_18 = arith.constant 0 : index
      %31 = vector.load %arg6[%c0_16, %c0_17, %c0_18] : memref<1x4x512xf32, #tpu.memory_space<vmem>>, vector<1x1x512xf32>
      %32 = vector.shape_cast %31 : vector<1x1x512xf32> to vector<1x512xf32>
      %33 = arith.addf %32, %17 : vector<1x512xf32>
      %c0_19 = arith.constant 0 : index
      %c0_20 = arith.constant 0 : index
      %c0_21 = arith.constant 0 : index
      %34 = vector.load %arg6[%c0_19, %c0_20, %c0_21] : memref<1x4x512xf32, #tpu.memory_space<vmem>>, vector<1x1x512xf32>
      %35 = vector.shape_cast %34 : vector<1x1x512xf32> to vector<1x512xf32>
      %36 = vector.shape_cast %33 : vector<1x512xf32> to vector<1x1x512xf32>
      tpu.vector_store %arg6[%c0_19, %c0_20, %c0_21], %36 {strides = array<i32>} : memref<1x4x512xf32, #tpu.memory_space<vmem>>, vector<1x1x512xf32>,
      %c0_22 = arith.constant 0 : index
      %c1_23 = arith.constant 1 : index
      %c0_24 = arith.constant 0 : index
      %37 = vector.load %arg6[%c0_22, %c1_23, %c0_24] : memref<1x4x512xf32, #tpu.memory_space<vmem>>, vector<1x1x512xf32>
      %38 = vector.shape_cast %37 : vector<1x1x512xf32> to vector<1x512xf32>
      %39 = arith.addf %38, %20 : vector<1x512xf32>
      %c0_25 = arith.constant 0 : index
      %c1_26 = arith.constant 1 : index
      %c0_27 = arith.constant 0 : index
      %40 = vector.load %arg6[%c0_25, %c1_26, %c0_27] : memref<1x4x512xf32, #tpu.memory_space<vmem>>, vector<1x1x512xf32>
      %41 = vector.shape_cast %40 : vector<1x1x512xf32> to vector<1x512xf32>
      %42 = vector.shape_cast %39 : vector<1x512xf32> to vector<1x1x512xf32>
      tpu.vector_store %arg6[%c0_25, %c1_26, %c0_27], %42 {strides = array<i32>} : memref<1x4x512xf32, #tpu.memory_space<vmem>>, vector<1x1x512xf32>,
      %c0_28 = arith.constant 0 : index
      %c2 = arith.constant 2 : index
      %c0_29 = arith.constant 0 : index
      %43 = vector.load %arg6[%c0_28, %c2, %c0_29] : memref<1x4x512xf32, #tpu.memory_space<vmem>>, vector<1x1x512xf32>
      %44 = vector.shape_cast %43 : vector<1x1x512xf32> to vector<1x512xf32>
      %45 = arith.maximumf %44, %22 : vector<1x512xf32>
      %c0_30 = arith.constant 0 : index
      %c2_31 = arith.constant 2 : index
      %c0_32 = arith.constant 0 : index
      %46 = vector.load %arg6[%c0_30, %c2_31, %c0_32] : memref<1x4x512xf32, #tpu.memory_space<vmem>>, vector<1x1x512xf32>
      %47 = vector.shape_cast %46 : vector<1x1x512xf32> to vector<1x512xf32>
      %48 = vector.shape_cast %45 : vector<1x512xf32> to vector<1x1x512xf32>
      tpu.vector_store %arg6[%c0_30, %c2_31, %c0_32], %48 {strides = array<i32>} : memref<1x4x512xf32, #tpu.memory_space<vmem>>, vector<1x1x512xf32>,
      %c0_33 = arith.constant 0 : index
      %c3 = arith.constant 3 : index
      %c0_34 = arith.constant 0 : index
      %49 = vector.load %arg6[%c0_33, %c3, %c0_34] : memref<1x4x512xf32, #tpu.memory_space<vmem>>, vector<1x1x512xf32>
      %50 = vector.shape_cast %49 : vector<1x1x512xf32> to vector<1x512xf32>
      %51 = arith.minimumf %50, %24 : vector<1x512xf32>
      %c0_35 = arith.constant 0 : index
      %c3_36 = arith.constant 3 : index
      %c0_37 = arith.constant 0 : index
      %52 = vector.load %arg6[%c0_35, %c3_36, %c0_37] : memref<1x4x512xf32, #tpu.memory_space<vmem>>, vector<1x1x512xf32>
      %53 = vector.shape_cast %52 : vector<1x1x512xf32> to vector<1x512xf32>
      %54 = vector.shape_cast %51 : vector<1x512xf32> to vector<1x1x512xf32>
      tpu.vector_store %arg6[%c0_35, %c3_36, %c0_37], %54 {strides = array<i32>} : memref<1x4x512xf32, #tpu.memory_space<vmem>>, vector<1x1x512xf32>,
    } else {
    }
    return
  }
  func.func @transform_0(%arg0: i32, %arg1: i32) -> (i32, i32) {
    %c4_i32 = arith.constant 4 : i32
    %0 = arith.muli %arg0, %c4_i32 : i32
    %1 = arith.addi %0, %arg1 : i32
    %c0_i32 = arith.constant 0 : i32
    %c0_i32_0 = arith.constant 0 : i32
    return %1, %c0_i32 : i32, i32
  }
  func.func @transform_1(%arg0: i32, %arg1: i32) -> (i32, i32) {
    %c0_i32 = arith.constant 0 : i32
    %c0_i32_0 = arith.constant 0 : i32
    %c0_i32_1 = arith.constant 0 : i32
    return %c0_i32, %c0_i32_0 : i32, i32
  }
  func.func @transform_2(%arg0: i32, %arg1: i32) -> (i32, i32) {
    %c0_i32 = arith.constant 0 : i32
    %c0_i32_0 = arith.constant 0 : i32
    %c0_i32_1 = arith.constant 0 : i32
    return %c0_i32, %c0_i32_0 : i32, i32
  }
  func.func @transform_3(%arg0: i32, %arg1: i32) -> (i32, i32) {
    %c0_i32 = arith.constant 0 : i32
    %c0_i32_0 = arith.constant 0 : i32
    %c0_i32_1 = arith.constant 0 : i32
    return %c0_i32, %c0_i32_0 : i32, i32
  }
  func.func @transform_4(%arg0: i32, %arg1: i32) -> (i32, i32, i32) {
    %c0_i32 = arith.constant 0 : i32
    %c0_i32_0 = arith.constant 0 : i32
    %c0_i32_1 = arith.constant 0 : i32
    return %arg0, %c0_i32, %c0_i32_0 : i32, i32, i32
  }
}

module attributes {stable_mosaic.version = 11 : i64} {
  func.func @_fc_head_kernel(%arg0: i32, %arg1: memref<2x512xf32, #tpu.memory_space<vmem>>, %arg2: memref<2x512xf32, #tpu.memory_space<vmem>>, %arg3: memref<2x512xf32, #tpu.memory_space<vmem>>, %arg4: memref<512x256xbf16, #tpu.memory_space<vmem>>, %arg5: memref<1x256xf32, #tpu.memory_space<vmem>>, %arg6: memref<256x16xbf16, #tpu.memory_space<vmem>>, %arg7: memref<1x16xf32, #tpu.memory_space<vmem>>, %arg8: memref<2x16xf32, #tpu.memory_space<vmem>>) attributes {dimension_semantics = [#tpu.dimension_semantics<arbitrary>], iteration_bounds = array<i64: 1>, scalar_prefetch = 0 : i64, scratch_operands = 0 : i64, tpu.core_type = #tpu.core_type<tc>, window_params = [{pipeline_mode = #tpu.pipeline_mode<synchronous>, transform_indices = @transform_0, window_bounds = array<i64: 2, 512>}, {pipeline_mode = #tpu.pipeline_mode<synchronous>, transform_indices = @transform_1, window_bounds = array<i64: 2, 512>}, {pipeline_mode = #tpu.pipeline_mode<synchronous>, transform_indices = @transform_2, window_bounds = array<i64: 2, 512>}, {pipeline_mode = #tpu.pipeline_mode<synchronous>, transform_indices = @transform_3, window_bounds = array<i64: 512, 256>}, {pipeline_mode = #tpu.pipeline_mode<synchronous>, transform_indices = @transform_4, window_bounds = array<i64: 1, 256>}, {pipeline_mode = #tpu.pipeline_mode<synchronous>, transform_indices = @transform_5, window_bounds = array<i64: 256, 16>}, {pipeline_mode = #tpu.pipeline_mode<synchronous>, transform_indices = @transform_6, window_bounds = array<i64: 1, 16>}, {pipeline_mode = #tpu.pipeline_mode<synchronous>, transform_indices = @transform_7, window_bounds = array<i64: 2, 16>}]} {
    %c0 = arith.constant 0 : index
    %c0_0 = arith.constant 0 : index
    %0 = vector.load %arg3[%c0, %c0_0] : memref<2x512xf32, #tpu.memory_space<vmem>>, vector<1x512xf32>
    %c1 = arith.constant 1 : index
    %c0_1 = arith.constant 0 : index
    %1 = vector.load %arg3[%c1, %c0_1] : memref<2x512xf32, #tpu.memory_space<vmem>>, vector<1x512xf32>
    %cst = arith.constant 0.000000e+00 : f32
    %2 = vector.broadcast %cst : f32 to vector<1x512xf32>
    %3 = arith.cmpf oge, %0, %2 : vector<1x512xf32>
    %c0_2 = arith.constant 0 : index
    %c0_3 = arith.constant 0 : index
    %4 = vector.load %arg1[%c0_2, %c0_3] : memref<2x512xf32, #tpu.memory_space<vmem>>, vector<2x512xf32>
    %5 = vector.broadcast %0 : vector<1x512xf32> to vector<2x512xf32>
    %6 = arith.mulf %5, %4 : vector<2x512xf32>
    %c0_4 = arith.constant 0 : index
    %c0_5 = arith.constant 0 : index
    %7 = vector.load %arg2[%c0_4, %c0_5] : memref<2x512xf32, #tpu.memory_space<vmem>>, vector<2x512xf32>
    %8 = vector.broadcast %0 : vector<1x512xf32> to vector<2x512xf32>
    %9 = arith.mulf %8, %7 : vector<2x512xf32>
    %10 = vector.shape_cast %3 : vector<1x512xi1> to vector<1x512xi1>
    %11 = vector.broadcast %10 : vector<1x512xi1> to vector<2x512xi1>
    %12 = arith.select %11, %6, %9 : vector<2x512xi1>, vector<2x512xf32>
    %13 = vector.broadcast %1 : vector<1x512xf32> to vector<2x512xf32>
    %14 = arith.addf %12, %13 : vector<2x512xf32>
    %cst_6 = arith.constant 0.000000e+00 : f32
    %15 = vector.broadcast %cst_6 : f32 to vector<2x512xf32>
    %16 = arith.maximumf %14, %15 : vector<2x512xf32>
    %17 = arith.truncf %16 : vector<2x512xf32> to vector<2x512xbf16>
    %c0_7 = arith.constant 0 : index
    %c0_8 = arith.constant 0 : index
    %18 = vector.load %arg4[%c0_7, %c0_8] : memref<512x256xbf16, #tpu.memory_space<vmem>>, vector<512x256xbf16>
    %cst_9 = arith.constant dense<0.000000e+00> : vector<2x256xf32>
    %19 = tpu.matmul %17, %18, %cst_9 {dimension_numbers = #tpu.dot_dimension_numbers<[1], [0], [0], [1], [0, 0, 1, 1], [], []>} : vector<2x512xbf16>, vector<512x256xbf16>, vector<2x256xf32> -> vector<2x256xf32>
    %c0_10 = arith.constant 0 : index
    %c0_11 = arith.constant 0 : index
    %20 = vector.load %arg5[%c0_10, %c0_11] : memref<1x256xf32, #tpu.memory_space<vmem>>, vector<1x256xf32>
    %21 = vector.broadcast %20 : vector<1x256xf32> to vector<2x256xf32>
    %22 = arith.addf %19, %21 : vector<2x256xf32>
    %cst_12 = arith.constant 0.000000e+00 : f32
    %23 = vector.broadcast %cst_12 : f32 to vector<2x256xf32>
    %24 = arith.maximumf %22, %23 : vector<2x256xf32>
    %25 = arith.truncf %24 : vector<2x256xf32> to vector<2x256xbf16>
    %c0_13 = arith.constant 0 : index
    %c0_14 = arith.constant 0 : index
    %26 = vector.load %arg6[%c0_13, %c0_14] : memref<256x16xbf16, #tpu.memory_space<vmem>>, vector<256x16xbf16>
    %cst_15 = arith.constant dense<0.000000e+00> : vector<2x16xf32>
    %27 = tpu.matmul %25, %26, %cst_15 {dimension_numbers = #tpu.dot_dimension_numbers<[1], [0], [0], [1], [0, 0, 1, 1], [], []>} : vector<2x256xbf16>, vector<256x16xbf16>, vector<2x16xf32> -> vector<2x16xf32>
    %c0_16 = arith.constant 0 : index
    %c0_17 = arith.constant 0 : index
    %28 = vector.load %arg7[%c0_16, %c0_17] : memref<1x16xf32, #tpu.memory_space<vmem>>, vector<1x16xf32>
    %29 = vector.broadcast %28 : vector<1x16xf32> to vector<2x16xf32>
    %30 = arith.addf %27, %29 : vector<2x16xf32>
    %c0_18 = arith.constant 0 : index
    %c0_19 = arith.constant 0 : index
    %31 = vector.load %arg8[%c0_18, %c0_19] : memref<2x16xf32, #tpu.memory_space<vmem>>, vector<2x16xf32>
    tpu.vector_store %arg8[%c0_18, %c0_19], %30 {strides = array<i32>} : memref<2x16xf32, #tpu.memory_space<vmem>>, vector<2x16xf32>,
    return
  }
  func.func @transform_0(%arg0: i32) -> (i32, i32) {
    %c0_i32 = arith.constant 0 : i32
    %c0_i32_0 = arith.constant 0 : i32
    %c0_i32_1 = arith.constant 0 : i32
    return %c0_i32, %c0_i32_0 : i32, i32
  }
  func.func @transform_1(%arg0: i32) -> (i32, i32) {
    %c0_i32 = arith.constant 0 : i32
    %c0_i32_0 = arith.constant 0 : i32
    %c0_i32_1 = arith.constant 0 : i32
    return %c0_i32, %c0_i32_0 : i32, i32
  }
  func.func @transform_2(%arg0: i32) -> (i32, i32) {
    %c0_i32 = arith.constant 0 : i32
    %c0_i32_0 = arith.constant 0 : i32
    %c0_i32_1 = arith.constant 0 : i32
    return %c0_i32, %c0_i32_0 : i32, i32
  }
  func.func @transform_3(%arg0: i32) -> (i32, i32) {
    %c0_i32 = arith.constant 0 : i32
    %c0_i32_0 = arith.constant 0 : i32
    %c0_i32_1 = arith.constant 0 : i32
    return %c0_i32, %c0_i32_0 : i32, i32
  }
  func.func @transform_4(%arg0: i32) -> (i32, i32) {
    %c0_i32 = arith.constant 0 : i32
    %c0_i32_0 = arith.constant 0 : i32
    %c0_i32_1 = arith.constant 0 : i32
    return %c0_i32, %c0_i32_0 : i32, i32
  }
  func.func @transform_5(%arg0: i32) -> (i32, i32) {
    %c0_i32 = arith.constant 0 : i32
    %c0_i32_0 = arith.constant 0 : i32
    %c0_i32_1 = arith.constant 0 : i32
    return %c0_i32, %c0_i32_0 : i32, i32
  }
  func.func @transform_6(%arg0: i32) -> (i32, i32) {
    %c0_i32 = arith.constant 0 : i32
    %c0_i32_0 = arith.constant 0 : i32
    %c0_i32_1 = arith.constant 0 : i32
    return %c0_i32, %c0_i32_0 : i32, i32
  }
  func.func @transform_7(%arg0: i32) -> (i32, i32) {
    %c0_i32 = arith.constant 0 : i32
    %c0_i32_0 = arith.constant 0 : i32
    %c0_i32_1 = arith.constant 0 : i32
    return %c0_i32, %c0_i32_0 : i32, i32
  }
}

</mosaic_0001>

<bundles_post_ra>
// kernel: simple_transformer.3
= control target key start
LH: loop header
LB: loop body
LE: loop exit
PB: predicated region body
PF: predicated region fallthrough
CT: control target
= control target key end

     0   :  { %11 = vsyncpa [#allocation3], 0  ;;  %s1106_s18 = smov 0   ;;  %s1242_s0 = inlined_call_operand.vmem [shape: bf16[256,4], index: 0, kind: input, shape index: {}]   ;;  %s1243_s1 = inlined_call_operand.vmem [shape: f32[5,64], index: 1, kind: input, shape index: {}]   ;;  %s1244_s2 = inlined_call_operand.hbm [shape: bf16[64,128], index: 2, kind: input, shape index: {}]   ;;  %s1245_s3 = inlined_call_operand.vmem [shape: f32[3,128], index: 3, kind: input, shape index: {}]   ;;  %s1246_s4 = inlined_call_operand.vmem [shape: bf16[256,128], index: 4, kind: output, shape index: {0}]   ;;  %s1247_s5 = inlined_call_operand.vmem [shape: f32[4,2,128], index: 5, kind: output, shape index: {1}]  }
   0x1 LB: > { %s1112_s19 = sadd.s32 4294967295, %s1067_s18   ;;  %p796_p0 = scmp.ge.s32.totalorder %s1067_s18, 1  ;;  %s1067_s18 = sphi %s1106_s18, %s17_s18  }
   0x2   : > { %p163_p1 = scmp.lt.s32.totalorder %s1067_s18, 5  ;;  %s1069_s20 = smov [#allocation2]  }
   0x3   : > { %s178_s21 = sshll.u32 %s1069_s20, 4  ;;  %p1248_p3 = scmp.eq.s32.totalorder %s1112_s19, 0  ;;  %s179_s21 = int_to_ptr.vmem [resolvable:$true] %s178_s21 }
   0x4   : > { %p1116_p2 = pnand %p796_p0, %p163_p1  ;;  %s1029_s26 = scalar_lea.hbm %s1244_s2, 512 }
   0x5   : > { %p1030_p6 = scmp.ne.s32.totalorder %s1244_s2, %s1029_s26  ;;  %p1036_p10 = scmp.lt.u32.totalorder %s1029_s26, %s1244_s2 }
   0x6   : > { %s1250_s22 = scalar_select %p1116_p2, 1, 0 }
   0x7   : > { %p911_p4 = pneg %p1116_p2 }
   0x9   : > { %p1125_p5 = pnand %p1248_p3, %p911_p4 }
   0xb   : > { %p1031_p7 = pneg %p1125_p5 }
   0xd   : > { %p1032_p8 = pnand %p1031_p7, %p1030_p6 }
   0xf   : > { %p1033_p9 = pneg %p1032_p8 }
  0x11   : > { %p1038_p11 = pnand %p1036_p10, %p1033_p9 }
  0x13   : > { %1041 = shalt.err (!%p1038_p11)
}
  0x14   : > { %s1042_s6 = scalar_lea.vmem %s179_s21, 512  ;;  %p1050_p1 = scmp.lt.s32.totalorder %s179_s21, %s179_s21 }
  0x15   : > { %p1043_p12 = scmp.ne.s32.totalorder %s179_s21, %s1042_s6  ;;  %p1051_p4 = scmp.lt.s32.totalorder %s1042_s6, %s1042_s6 }
  0x17   : > { %p1045_p13 = pnand %p1043_p12, %p1031_p7  ;;  %p1052_p3 = por %p1051_p4, %p1050_p1 }
  0x19   : > { %p1046_p0 = pneg %p1045_p13 }
  0x1b   : > { %p1053_p2 = pnand %p1052_p3, %p1046_p0 }
  0x1d   : > { %1056 = shalt.err (!%p1053_p2)
}
  0x1e   : > { %s1070_s7 = smov 64   ;;  %s1071_s8 = smov 4  }
  0x1f   : > { %914 = dma.hbm_to_vmem [thread:$0]  (!%p1125_p5), %s1244_s2, 512, %s179_s21, [#allocation3], %s1070_s7, %s1070_s7, %s1071_s8  }
  0x20   : > { %p1252_p6 = scmp.ne.s32.totalorder %s1250_s22, 0 }
  0x21   : > { %p1253_p8 = scmp.eq.s32.totalorder (!%p1252_p6), %s1112_s19, 0 }
  0x22   : > { %206 = sbr.rel (%p1252_p6) target bundleno = 471 (0x1d7), region = 36 }
  0x29   : > { %1062 = dma.done.wait (%p1253_p8), [#allocation3], 512   ;;  %p1254_p7 = pmov %p1253_p8 }
  0x2a   : > { %s801_s11 = sshll.u32 %s1112_s19, 3  ;;  %v1072_v0 = vmov 1   ;;  %v1073_v1 = vmov 0   ;;  %v1074_v10 = vmov 2   ;;  %v1025_v12 = vld [vmem:[#allocation2] sm:$0xff]   ;;  %v1026_v16 = vld [vmem:[#allocation2 + $0x8] sm:$0xff]   ;;  %v312_v24 = vlaneseq }
  0x2b   : > { %1064 = vsyncadd (%p1254_p7), [#allocation3], 4294966784  ;;  %943 = vset.pattern.permute.xlu1 %v1072_v0  ;;  %932 = vset.pattern.permute.xlu0 %v1073_v1  ;;  %p239_p2 = scmp.lt.s32.totalorder %s801_s11, 31  ;;  %v1075_v17 = vmov 3   ;;  %v1027_v21 = vld [vmem:[#allocation2 + $0x10] sm:$0xff]   ;;  %v1028_v23 = vld [vmem:[#allocation2 + $0x18] sm:$0xff]  }
  0x2c   : > { %883 = vmatprep.subr.bf16.mxu0 %v1025_v12  ;;  %899 = vmatprep.subr.bf16.mxu1 %v1025_v12  ;;  %v313_v25 = vshrl.u32 %v312_v24, 7  ;;  %v271_v27 = vld [vmem:[%s1243_s1] sm:$0x1f]  ;;  %vm541_vm0 = vcmask 523264   ;;  %p250_p3 = scmp.lt.s32.totalorder %s1112_s19, 3 }
  0x2d   : > { %s1256_s11 = smov (!%p239_p2, %s801_s11), 31  ;;  %884 = vmatpush3.bf16.msra.mxu0 %v1025_v12  ;;  %903 = vmatpush3.bf16.msra.mxu1 %v1025_v12 }
  0x2e   : > { %s802_s12 = sshll.u32 %s1256_s11, 2  ;;  %885 = vmatprep.subr.bf16.mxu0 %v1026_v16  ;;  %900 = vmatprep.subr.bf16.mxu1 %v1026_v16  ;;  %v314_v26 = vsub.s32 0, %v313_v25  ;;  %v326_v31 = vsub.s32 4, %v313_v25  ;;  %v370_v36 = vsub.s32 1, %v313_v25  ;;  %v422_v37 = vsub.s32 2, %v313_v25  ;;  %s1258_s19 = smov (!%p250_p3, %s1112_s19), 3 }
  0x2f   : > { %s242_s15 = scalar_lea.vmem %s1242_s0, %s802_s12  ;;  %v474_v43 = vsub.s32 3, %v313_v25  ;;  %s1228_s24 = scalar_lea.vmem %s1246_s4, %s802_s12 }
  0x30   : > { %v834_v2 = vld [vmem:[%s242_s15] sm:$0xff]   ;;  %v869_v3 = vld [vmem:[%s242_s15 + $0x8] sm:$0xff]   ;;  %v870_v11 = vld [vmem:[%s242_s15 + $0x10] sm:$0xff]   ;;  %v1166_v30 = vrot.slane %v271_v27, %v314_v26  ;;  %v1168_v40 = vrot.slane %v271_v27, %v326_v31  ;;  %v1174_v48 = vrot.slane %v271_v27, %v370_v36  ;;  %v1176_v51 = vrot.slane %v271_v27, %v422_v37  ;;  %s805_s25 = sshll.u32 %s1258_s19, 1 }
  0x31   : > { %v835_v4 = vunpack.c.l.bf16 %v834_v2  ;;  %v836_v5 = vunpack.c.h.bf16 %v834_v2  ;;  %v839_v6 = vunpack.c.l.bf16 %v869_v3  ;;  %v840_v7 = vunpack.c.h.bf16 %v869_v3  ;;  %v871_v15 = vld [vmem:[%s242_s15 + $0x18] sm:$0xff]   ;;  %886 = vmatpush3.bf16.msra.mxu0 %v1026_v16  ;;  %904 = vmatpush3.bf16.msra.mxu1 %v1026_v16  ;;  %s253_s28 = scalar_lea.vmem %s1247_s5, %s805_s25 }
  0x32   : > { %v843_v13 = vunpack.c.l.bf16 %v870_v11  ;;  %v844_v14 = vunpack.c.h.bf16 %v870_v11  ;;  %v847_v19 = vunpack.c.l.bf16 %v871_v15  ;;  %v848_v20 = vunpack.c.h.bf16 %v871_v15  ;;  %887 = vmatprep.subr.bf16.mxu0 %v1027_v21  ;;  %901 = vmatprep.subr.bf16.mxu1 %v1027_v21 }
  0x33   : > { %v944_v8 = vpack.i.bf16 %v836_v5, %v835_v4  ;;  %v949_v9 = vpack.i.bf16 %v840_v7, %v839_v6 }
  0x34   : > { %v979_v18 = vpack.i.bf16 %v844_v14, %v843_v13  ;;  %v984_v22 = vpack.i.bf16 %v848_v20, %v847_v19 }
  0x35   : > { %945 = vperm.xlu1 %943, %v944_v8   ;;  %934 = vperm.xlu0 %932, %v944_v8  }
  0x36   : > { %888 = vmatpush3.bf16.msra.mxu0 %v1027_v21  ;;  %905 = vmatpush3.bf16.msra.mxu1 %v1027_v21 }
  0x37   : > { %889 = vmatprep.subr.bf16.mxu0 %v1028_v23  ;;  %902 = vmatprep.subr.bf16.mxu1 %v1028_v23 }
  0x39   : > { %950 = vperm.xlu1 %943, %v949_v9   ;;  %939 = vperm.xlu0 %932, %v949_v9  }
  0x3a   : > { %890 = vmatpush3.bf16.msra.mxu0 %v1028_v23  ;;  %906 = vmatpush3.bf16.msra.mxu1 %v1028_v23 }
  0x3d   : > { %960 = vset.pattern.permute.xlu1 %v1074_v10  ;;  %954 = vset.pattern.permute.xlu0 %v1074_v10 }
  0x3e   : > { %962 = vperm.xlu1 %960, %v949_v9   ;;  %956 = vperm.xlu0 %954, %v944_v8  }
  0x42   : > { %966 = vset.pattern.permute.xlu1 %v1075_v17  ;;  %972 = vset.pattern.permute.xlu0 %v1075_v17 }
  0x43   : > { %968 = vperm.xlu1 %966, %v944_v8   ;;  %974 = vperm.xlu0 %972, %v949_v9  }
  0x47   : > { %978 = vset.pattern.permute.xlu1 %v1073_v1  ;;  %989 = vset.pattern.permute.xlu0 %v1072_v0 }
  0x48   : > { %980 = vperm.xlu1 %978, %v979_v18   ;;  %991 = vperm.xlu0 %989, %v979_v18  }
  0x4c   : > { %985 = vperm.xlu1 %978, %v984_v22   ;;  %1007 = vset.pattern.permute.xlu0 %v1074_v10 }
  0x4d   : > { %1009 = vperm.xlu0 %1007, %v984_v22  }
  0x50   : > { %995 = vset.pattern.permute.xlu1 %v1072_v0  ;;  %v1184_v0 = vrot.slane %v271_v27, %v474_v43 }
  0x51   : > { %997 = vperm.xlu1 %995, %v984_v22   ;;  %1024 = vset.pattern.permute.xlu0 %v1075_v17 }
  0x55   : > { %1001 = vset.pattern.permute.xlu1 %v1074_v10 }
  0x56   : > { %1003 = vperm.xlu1 %1001, %v979_v18  }
  0x5a   : > { %1013 = vset.pattern.permute.xlu1 %v1075_v17 }
  0x5b   : > { %1015 = vperm.xlu1 %1013, %v979_v18  }
  0x5f   : > { %1020 = vperm.xlu1 %1013, %v984_v22  }
  0xb4   : > { %v946_v28 = vpop.permute.xlu1 %945  ;;  %v935_v29 = vpop.permute.xlu0 %934 }
  0xb5   : > { %v937_v32 = vunpack.i.h.bf16 %v935_v29  ;;  %v936_v33 = vunpack.i.l.bf16 %v935_v29  ;;  %v948_v49 = vunpack.i.h.bf16 %v946_v28  ;;  %v947_v50 = vunpack.i.l.bf16 %v946_v28 }
  0xb7   : > { %v317_v41 = vmul.f32 %v937_v32, %v1166_v30  ;;  %v316_v42 = vmul.f32 %v936_v33, %v1166_v30  ;;  %v373_v1 = vmul.f32 %v948_v49, %v1174_v48  ;;  %v372_v2 = vmul.f32 %v947_v50, %v1174_v48 }
  0xb8   : > { %v951_v34 = vpop.permute.xlu1 %950  ;;  %v940_v35 = vpop.permute.xlu0 %939 }
  0xb9   : > { %v942_v38 = vunpack.i.h.bf16 %v940_v35  ;;  %v941_v39 = vunpack.i.l.bf16 %v940_v35  ;;  %v953_v44 = vunpack.i.h.bf16 %v951_v34  ;;  %v952_v45 = vunpack.i.l.bf16 %v951_v34 }
  0xba   : > { %v329_v58 = vadd.f32 %v1168_v40, %v317_v41  ;;  %v328_v59 = vadd.f32 %v1168_v40, %v316_v42 }
  0xbb   : > { %v319_v46 = vmul.f32 %v942_v38, %v1166_v30  ;;  %v318_v47 = vmul.f32 %v941_v39, %v1166_v30  ;;  %v375_v62 = vmul.f32 %v953_v44, %v1174_v48  ;;  %v374_v63 = vmul.f32 %v952_v45, %v1174_v48 }
  0xbc   : > { %v380_v11 = vadd.f32 %v372_v2, %v328_v59  ;;  %v381_v12 = vadd.f32 %v373_v1, %v329_v58 }
  0xbd   : > { %v963_v52 = vpop.permute.xlu1 %962  ;;  %v957_v53 = vpop.permute.xlu0 %956  ;;  %v331_v54 = vadd.f32 %v1168_v40, %v319_v46  ;;  %v330_v55 = vadd.f32 %v1168_v40, %v318_v47 }
  0xbe   : > { %v965_v56 = vunpack.i.h.bf16 %v963_v52  ;;  %v964_v57 = vunpack.i.l.bf16 %v963_v52  ;;  %v959_v60 = vunpack.i.h.bf16 %v957_v53  ;;  %v958_v61 = vunpack.i.l.bf16 %v957_v53 }
  0xbf   : > { %v382_v6 = vadd.f32 %v374_v63, %v330_v55  ;;  %v383_v7 = vadd.f32 %v375_v62, %v331_v54 }
  0xc0   : > { %v425_v3 = vmul.f32 %v959_v60, %v1176_v51  ;;  %v424_v4 = vmul.f32 %v958_v61, %v1176_v51  ;;  %v427_v5 = vmul.f32 %v965_v56, %v1176_v51  ;;  %v426_v8 = vmul.f32 %v964_v57, %v1176_v51 }
  0xc2   : > { %v969_v9 = vpop.permute.xlu1 %968  ;;  %v975_v10 = vpop.permute.xlu0 %974  ;;  %v432_v17 = vadd.f32 %v424_v4, %v380_v11  ;;  %v433_v18 = vadd.f32 %v425_v3, %v381_v12  ;;  %v434_v21 = vadd.f32 %v426_v8, %v382_v6  ;;  %v435_v22 = vadd.f32 %v427_v5, %v383_v7 }
  0xc3   : > { %v971_v13 = vunpack.i.h.bf16 %v969_v9  ;;  %v970_v14 = vunpack.i.l.bf16 %v969_v9  ;;  %v977_v15 = vunpack.i.h.bf16 %v975_v10  ;;  %v976_v16 = vunpack.i.l.bf16 %v975_v10 }
  0xc5   : > { %v477_v19 = vmul.f32 %v971_v13, %v1184_v0  ;;  %v476_v20 = vmul.f32 %v970_v14, %v1184_v0  ;;  %v479_v23 = vmul.f32 %v977_v15, %v1184_v0  ;;  %v478_v24 = vmul.f32 %v976_v16, %v1184_v0 }
  0xc7   : > { %v981_v25 = vpop.permute.xlu1 %980  ;;  %v484_v26 = vadd.f32 %v476_v20, %v432_v17  ;;  %v485_v27 = vadd.f32 %v477_v19, %v433_v18  ;;  %v486_v28 = vadd.f32 %v478_v24, %v434_v21  ;;  %v487_v29 = vadd.f32 %v479_v23, %v435_v22  ;;  %v992_v41 = vpop.permute.xlu0 %991 }
  0xc8   : > { %v983_v38 = vunpack.i.h.bf16 %v981_v25  ;;  %v982_v39 = vunpack.i.l.bf16 %v981_v25  ;;  %v994_v47 = vunpack.i.h.bf16 %v992_v41  ;;  %v993_v49 = vunpack.i.l.bf16 %v992_v41 }
  0xc9   : > { %v492_v31 = vmax.f32 %v484_v26, 0.0  ;;  %v493_v32 = vmax.f32 %v485_v27, 0.0  ;;  %v494_v33 = vmax.f32 %v486_v28, 0.0  ;;  %v495_v34 = vmax.f32 %v487_v29, 0.0 }
  0xca   : > { %v321_v45 = vmul.f32 %v983_v38, %v1166_v30  ;;  %v320_v46 = vmul.f32 %v982_v39, %v1166_v30  ;;  %v377_v61 = vmul.f32 %v994_v47, %v1174_v48  ;;  %v376_v62 = vmul.f32 %v993_v49, %v1174_v48 }
  0xcb   : > { %v986_v35 = vpop.permute.xlu1 %985  ;;  %v500_v36 = vpack.c.bf16 %v493_v32, %v492_v31  ;;  %v501_v37 = vpack.c.bf16 %v495_v34, %v494_v33 }
  0xcc   : > { %v988_v43 = vunpack.i.h.bf16 %v986_v35  ;;  %v987_v44 = vunpack.i.l.bf16 %v986_v35  ;;  %v1010_v53 = vpop.permute.xlu0 %1009  ;;  %v333_v59 = vadd.f32 %v1168_v40, %v321_v45  ;;  %v332_v60 = vadd.f32 %v1168_v40, %v320_v46  ;;  %v806_v35 = vld [vmem:[%s1245_s3] ss:$0 sm:$0xff] }
  0xcd   : > { %891 = vmatprep.mubr.msk.bf16.mxu0 %vm541_vm0, %v500_v36  ;;  %v1012_v2 = vunpack.i.h.bf16 %v1010_v53  ;;  %v1011_v3 = vunpack.i.l.bf16 %v1010_v53 }
  0xce   : > { %892 = vmatmul.mubr.msk.bf16.vlgmr.msra.gmra.mrb[0].mxu0 %vm541_vm0, %v501_v37  ;;  %v323_v55 = vmul.f32 %v988_v43, %v1166_v30  ;;  %v322_v56 = vmul.f32 %v987_v44, %v1166_v30  ;;  %v385_v8 = vadd.f32 %v377_v61, %v333_v59  ;;  %v384_v9 = vadd.f32 %v376_v62, %v332_v60 }
  0xcf   : > { %v431_v14 = vmul.f32 %v1012_v2, %v1176_v51 }
  0xd0   : > { %v998_v42 = vpop.permute.xlu1 %997  ;;  %v335_v5 = vadd.f32 %v1168_v40, %v323_v55  ;;  %v334_v6 = vadd.f32 %v1168_v40, %v322_v56 }
  0xd1   : > { %v1000_v50 = vunpack.i.h.bf16 %v998_v42  ;;  %v999_v52 = vunpack.i.l.bf16 %v998_v42 }
  0xd3   : > { %v379_v63 = vmul.f32 %v1000_v50, %v1174_v48  ;;  %v378_v1 = vmul.f32 %v999_v52, %v1174_v48  ;;  %v430_v48 = vmul.f32 %v1011_v3, %v1176_v51 }
  0xd5   : > { %v1004_v54 = vpop.permute.xlu1 %1003  ;;  %v386_v12 = vadd.f32 %v378_v1, %v334_v6  ;;  %v387_v13 = vadd.f32 %v379_v63, %v335_v5 }
  0xd6   : > { %v1006_v57 = vunpack.i.h.bf16 %v1004_v54  ;;  %v1005_v58 = vunpack.i.l.bf16 %v1004_v54 }
  0xd7   : > { %v439_v23 = vadd.f32 %v431_v14, %v387_v13  ;;  %v438_v24 = vadd.f32 %v430_v48, %v386_v12 }
  0xd8   : > { %v429_v4 = vmul.f32 %v1006_v57, %v1176_v51  ;;  %v428_v30 = vmul.f32 %v1005_v58, %v1176_v51 }
  0xda   : > { %v1016_v7 = vpop.permute.xlu1 %1015  ;;  %v436_v15 = vadd.f32 %v428_v30, %v384_v9  ;;  %v437_v16 = vadd.f32 %v429_v4, %v385_v8 }
  0xdb   : > { %v1018_v10 = vunpack.i.h.bf16 %v1016_v7  ;;  %v1017_v11 = vunpack.i.l.bf16 %v1016_v7 }
  0xdd   : > { %v481_v17 = vmul.f32 %v1018_v10, %v1184_v0  ;;  %v480_v18 = vmul.f32 %v1017_v11, %v1184_v0 }
  0xde   : > { %v1021_v19 = vpop.permute.xlu1 %1020 }
  0xdf   : > { %v1023_v20 = vunpack.i.h.bf16 %v1021_v19  ;;  %v1022_v40 = vunpack.i.l.bf16 %v1021_v19  ;;  %v488_v21 = vadd.f32 %v480_v18, %v436_v15  ;;  %v489_v22 = vadd.f32 %v481_v17, %v437_v16 }
  0xe1   : > { %v483_v25 = vmul.f32 %v1023_v20, %v1184_v0  ;;  %v482_v26 = vmul.f32 %v1022_v40, %v1184_v0  ;;  %v496_v27 = vmax.f32 %v488_v21, 0.0  ;;  %v497_v28 = vmax.f32 %v489_v22, 0.0 }
  0xe3   : > { %v490_v51 = vadd.f32 %v482_v26, %v438_v24  ;;  %v491_v29 = vadd.f32 %v483_v25, %v439_v23  ;;  %v502_v31 = vpack.c.bf16 %v497_v28, %v496_v27 }
  0xe5   : > { %v498_v32 = vmax.f32 %v490_v51, 0.0  ;;  %v499_v33 = vmax.f32 %v491_v29, 0.0  ;;  %895 = vmatprep.mubr.msk.bf16.mxu1 %vm541_vm0, %v502_v31 }
  0xe7   : > { %v503_v34 = vpack.c.bf16 %v499_v33, %v498_v32 }
  0xe9   : > { %896 = vmatmul.mubr.msk.bf16.vlgmr.msra.gmra.mrb[0].mxu1 %vm541_vm0, %v503_v34 }
 0x1a1   : > { %v893_v36 = vpop.f32.mrb[0].mxu0 }
 0x1a2   : > { %v588_v37 = vpop.f32.mrb[1].mxu0  ;;  %v597_v39 = vadd.f32 %v893_v36, %v806_v35 }
 0x1a3   : > { %v589_v0 = vadd.f32 %v806_v35, %v588_v37  ;;  %v894_v38 = vpop.f32.mrb[2].mxu0 }
 0x1a4   : > { %v600_v41 = vadd.f32 %v894_v38, %v806_v35  ;;  %v591_v42 = vpop.f32.mrb[3].mxu0  ;;  %v635_v50 = vmul.f32 %v597_v39, %v597_v39 }
 0x1a5   : > { %v592_v43 = vadd.f32 %v806_v35, %v591_v42  ;;  %v633_v45 = vmul.f32 %v589_v0, %v589_v0 }
 0x1a6   : > { %v857_v44 = vpack.c.bf16 %v600_v41, %v597_v39  ;;  %v636_v54 = vmul.f32 %v600_v41, %v600_v41 }
 0x1a7   : > { %v619_v46 = vadd.f32 %v592_v43, %v589_v0  ;;  %v634_v47 = vmul.f32 %v592_v43, %v592_v43  ;;  %v852_v49 = vpack.c.bf16 %v592_v43, %v589_v0 }
 0x1a8   : > { %872 = vst [vmem:[%s1228_s24 + $0x8] sm:$0xff] %v857_v44  }
 0x1a9   : > { %v620_v52 = vadd.f32 %v619_v46, %v597_v39  ;;  %v641_v53 = vadd.f32 %v634_v47, %v633_v45  ;;  %853 = vst [vmem:[%s1228_s24] sm:$0xff] %v852_v49  }
 0x1ab   : > { %v642_v55 = vadd.f32 %v641_v53, %v635_v50  ;;  %v621_v56 = vadd.f32 %v620_v52, %v600_v41 }
 0x1ad   : > { %v643_v57 = vadd.f32 %v642_v55, %v636_v54 }
 0x1bc   : > { %v897_v58 = vpop.f32.mrb[0].mxu1 }
 0x1bd   : > { %v604_v59 = vpop.f32.mrb[1].mxu1  ;;  %v613_v62 = vadd.f32 %v897_v58, %v806_v35 }
 0x1be   : > { %v605_v60 = vadd.f32 %v806_v35, %v604_v59  ;;  %v898_v61 = vpop.f32.mrb[2].mxu1 }
 0x1bf   : > { %v616_v63 = vadd.f32 %v898_v61, %v806_v35  ;;  %v607_v1 = vpop.f32.mrb[3].mxu1  ;;  %v639_v9 = vmul.f32 %v613_v62, %v613_v62 }
 0x1c0   : > { %v622_v2 = vadd.f32 %v621_v56, %v605_v60  ;;  %v637_v3 = vmul.f32 %v605_v60, %v605_v60  ;;  %v608_v4 = vadd.f32 %v806_v35, %v607_v1 }
 0x1c1   : > { %v867_v30 = vpack.c.bf16 %v616_v63, %v613_v62  ;;  %v640_v12 = vmul.f32 %v616_v63, %v616_v63 }
 0x1c2   : > { %v644_v5 = vadd.f32 %v643_v57, %v637_v3  ;;  %v623_v6 = vadd.f32 %v622_v2, %v608_v4  ;;  %v638_v7 = vmul.f32 %v608_v4, %v608_v4  ;;  %v862_v8 = vpack.c.bf16 %v608_v4, %v605_v60 }
 0x1c3   : > { %874 = vst [vmem:[%s1228_s24 + $0x18] sm:$0xff] %v867_v30  }
 0x1c4   : > { %v624_v10 = vadd.f32 %v623_v6, %v613_v62  ;;  %v645_v11 = vadd.f32 %v644_v5, %v638_v7  ;;  %873 = vst [vmem:[%s1228_s24 + $0x10] sm:$0xff] %v862_v8  }
 0x1c6   : > { %v625_v13 = vadd.f32 %v624_v10, %v616_v63  ;;  %v646_v14 = vadd.f32 %v645_v11, %v639_v9 }
 0x1c8   : > { %v626_v48 = vrot.slane %v625_v13, 4  ;;  %v647_v15 = vadd.f32 %v646_v14, %v640_v12 }
 0x1ca   : > { %v627_v16 = vadd.f32 %v626_v48, %v625_v13  ;;  %v648_v17 = vrot.slane %v647_v15, 4 }
 0x1cc   : > { %v628_v18 = vrot.slane %v627_v16, 2  ;;  %v649_v19 = vadd.f32 %v648_v17, %v647_v15 }
 0x1ce   : > { %v629_v20 = vadd.f32 %v628_v18, %v627_v16  ;;  %v650_v40 = vrot.slane %v649_v19, 2 }
 0x1d0   : > { %v630_v21 = vrot.slane %v629_v20, 1  ;;  %v651_v22 = vadd.f32 %v650_v40, %v649_v19 }
 0x1d2   : > { %v631_v23 = vadd.f32 %v630_v21, %v629_v20  ;;  %v652_v24 = vrot.slane %v651_v22, 1 }
 0x1d4   : > { %632 = vst [vmem:[%s253_s28] sm:$0x1] %v631_v23  ;;  %v653_v25 = vadd.f32 %v652_v24, %v651_v22 }
 0x1d6   : > { %654 = vst [vmem:[%s253_s28 + $0x1] sm:$0x1] %v653_v25 }
 0x1d7 PF: > { %s17_s18 = sadd.s32 1, %s1067_s18  }
 0x1d8   : > { %p14_p5 = scmp.ge.s32.totalorder %s17_s18, 6  }
 0x1da   :  { %16 = sbr.rel (!%p14_p5) target bundleno = 1 (0x1), region = 83 }
 0x1e1   :  { %731 = vsyncpa [#allocation3], 1 }
 0x1e2   :  { %733 = vsyncpa [#allocation3 + $0x1], 1 }

// kernel: simple_transformer.4
= control target key start
LH: loop header
LB: loop body
LE: loop exit
PB: predicated region body
PF: predicated region fallthrough
CT: control target
= control target key end

     0   :  { %s1303_s15 = smov 0   ;;  %s1305_s16 = smov 0   ;;  %s1611_s0 = inlined_call_operand.vmem [shape: bf16[256,128], index: 0, kind: input, shape index: {}]   ;;  %s1612_s1 = inlined_call_operand.vmem [shape: f32[2,128], index: 1, kind: input, shape index: {}]   ;;  %s1613_s2 = inlined_call_operand.vmem [shape: bf16[128,512], index: 2, kind: input, shape index: {}]   ;;  %s1614_s3 = inlined_call_operand.vmem [shape: f32[3,512], index: 3, kind: input, shape index: {}]   ;;  %s1615_s4 = inlined_call_operand.vmem [shape: f32[2,4,512], index: 4, kind: output, shape index: {}]  }
   0x1   :  { %s1307_s17 = smov 0   ;;  %s1309_s18 = smov 0  }
   0x2   :  { %s1311_s19 = smov 0  }
   0x3 LB: > { %s23_s20 = sadd.s32 1, %s1265_s17  ;;  %s26_s21 = sadd.s32 1, %s1269_s18  ;;  %s1273_s19 = sphi %s1311_s19, %s14_s19   ;;  %s1269_s18 = sphi %s1309_s18, %s1619_s18   ;;  %s1265_s17 = sphi %s1307_s17, %s1618_s17   ;;  %s1261_s16 = sphi %s1305_s16, %s1617_s16   ;;  %s1257_s15 = sphi %s1303_s15, %s1616_s15  }
   0x4   : > { %p24_p0 = scmp.ge.s32.totalorder %s23_s20, 4  ;;  %p1081_p1 = scmp.ge.s32.totalorder %s1273_s19, 1 }
   0x5   : > { %p183_p2 = scmp.lt.s32.totalorder %s1273_s19, 9 }
   0x6   : > { %s1621_s20 = smov (%p24_p0, %s23_s20), 0  ;;  %s1623_s21 = smov (!%p24_p0, %s26_s21), %s1269_s18 }
   0x7   : > { %p184_p3 = pnand %p1081_p1, %p183_p2  ;;  %p28_p4 = scmp.ge.s32.totalorder %s1623_s21, 2 }
   0x8   : > { %p221_p5 = scmp.lt.s32.totalorder (!%p184_p3), %s1261_s16, 1  ;;  %v1187_v0 = vld [vmem:[%s1613_s2 + $0x4] ss:$16 sps:$4 sm:$0xff] (!%p184_p3)   ;;  %v1189_v1 = vld [vmem:[%s1613_s2 + $0xc] ss:$16 sps:$4 sm:$0xff] (!%p184_p3)   ;;  %v1275_v2 = vmov (!%p184_p3), 0   ;;  %v293_v55 = vlaneseq (!%p184_p3) }
   0x9   : > { %s1625_s21 = smov (%p28_p4, %s1623_s21), 0  ;;  %187 = sbr.rel (%p184_p3) target bundleno = 332 (0x14c), region = 36 }
   0xa   : > { %505 = vmatprep.mubr.bf16.mxu0 (!%p184_p3), %v1275_v2  ;;  %558 = vmatprep.mubr.bf16.mxu1 (!%p184_p3), %v1275_v2  ;;  %s1082_s26 = sshll.u32 (!%p184_p3), %s1261_s16, 2  ;;  %v1191_v3 = vld [vmem:[%s1613_s2] ss:$16 sps:$4 sm:$0xff] (!%p184_p3)   ;;  %v1192_v4 = vld [vmem:[%s1613_s2 + $0x8] ss:$16 sps:$4 sm:$0xff] (!%p184_p3)   ;;  %v1456_v56 = vshrl.u32 (!%p184_p3), %v293_v55, 7 }
   0xb   : > { %473 = vmatprep.subr.bf16.mxu0 (!%p184_p3), %v1187_v0  ;;  %526 = vmatprep.subr.bf16.mxu1 (!%p184_p3), %v1189_v1  ;;  %v1193_v5 = vld [vmem:[%s1613_s2 + $0x24] ss:$16 sps:$4 sm:$0xff] (!%p184_p3)   ;;  %s212_s7 = sadd.s32 (!%p184_p3), %s1257_s15, %s1082_s26  ;;  %v1195_v6 = vld [vmem:[%s1613_s2 + $0x2c] ss:$16 sps:$4 sm:$0xff] (!%p184_p3)   ;;  %v1197_v7 = vld [vmem:[%s1613_s2 + $0x20] ss:$16 sps:$4 sm:$0xff] (!%p184_p3)  }
   0xc   : > { %474 = vmatpush1.bf16.msra.mxu0 (!%p184_p3), %v1191_v3  ;;  %527 = vmatpush1.bf16.msra.mxu1 (!%p184_p3), %v1192_v4  ;;  %v1198_v8 = vld [vmem:[%s1613_s2 + $0x28] ss:$16 sps:$4 sm:$0xff] (!%p184_p3)   ;;  %v1199_v9 = vld [vmem:[%s1613_s2 + $0x44] ss:$16 sps:$4 sm:$0xff] (!%p184_p3)   ;;  %v1201_v10 = vld [vmem:[%s1613_s2 + $0x4c] ss:$16 sps:$4 sm:$0xff] (!%p184_p3)  }
   0xd   : > { %475 = vmatprep.subr.bf16.mxu0 (!%p184_p3), %v1193_v5  ;;  %528 = vmatprep.subr.bf16.mxu1 (!%p184_p3), %v1195_v6  ;;  %v1203_v11 = vld [vmem:[%s1613_s2 + $0x40] ss:$16 sps:$4 sm:$0xff] (!%p184_p3)   ;;  %v1204_v12 = vld [vmem:[%s1613_s2 + $0x48] ss:$16 sps:$4 sm:$0xff] (!%p184_p3)   ;;  %v1205_v13 = vld [vmem:[%s1613_s2 + $0x64] ss:$16 sps:$4 sm:$0xff] (!%p184_p3)  }
   0xe   : > { %v1207_v14 = vld [vmem:[%s1613_s2 + $0x6c] ss:$16 sps:$4 sm:$0xff] (!%p184_p3)   ;;  %v1209_v15 = vld [vmem:[%s1613_s2 + $0x60] ss:$16 sps:$4 sm:$0xff] (!%p184_p3)   ;;  %v1210_v16 = vld [vmem:[%s1613_s2 + $0x68] ss:$16 sps:$4 sm:$0xff] (!%p184_p3)  }
   0xf   : > { %v1211_v17 = vld [vmem:[%s1613_s2 + $0x84] ss:$16 sps:$4 sm:$0xff] (!%p184_p3)   ;;  %v1213_v18 = vld [vmem:[%s1613_s2 + $0x8c] ss:$16 sps:$4 sm:$0xff] (!%p184_p3)   ;;  %v1215_v19 = vld [vmem:[%s1613_s2 + $0x80] ss:$16 sps:$4 sm:$0xff] (!%p184_p3)  }
  0x10   : > { %s1627_s16 = smov (!%p221_p5, %s1261_s16), 1  ;;  %476 = vmatpush1.bf16.msra.mxu0 %v1197_v7  ;;  %529 = vmatpush1.bf16.msra.mxu1 %v1198_v8  ;;  %v1216_v20 = vld [vmem:[%s1613_s2 + $0x88] ss:$16 sps:$4 sm:$0xff]   ;;  %v1217_v21 = vld [vmem:[%s1613_s2 + $0xa4] ss:$16 sps:$4 sm:$0xff]   ;;  %v295_v57 = vsub.s32 0, %v1456_v56 }
  0x11   : > { %s1134_s8 = sshll.u32 %s1627_s16, 4  ;;  %s1083_s16 = sshll.u32 %s212_s7, 2  ;;  %477 = vmatprep.subr.bf16.mxu0 %v1199_v9  ;;  %530 = vmatprep.subr.bf16.mxu1 %v1201_v10  ;;  %v1219_v22 = vld [vmem:[%s1613_s2 + $0xac] ss:$16 sps:$4 sm:$0xff]   ;;  %v1221_v23 = vld [vmem:[%s1613_s2 + $0xa0] ss:$16 sps:$4 sm:$0xff]  }
  0x12   : > { %s1367_s22 = scalar_lea.vmem %s1615_s4, %s1134_s8  ;;  %p214_p6 = scmp.lt.s32.totalorder %s1083_s16, 31  ;;  %v1222_v24 = vld [vmem:[%s1613_s2 + $0xa8] ss:$16 sps:$4 sm:$0xff]   ;;  %v1223_v25 = vld [vmem:[%s1613_s2 + $0xc4] ss:$16 sps:$4 sm:$0xff]   ;;  %v303_v58 = vsub.s32 2, %v1456_v56 }
  0x13   : > { %v1225_v26 = vld [vmem:[%s1613_s2 + $0xcc] ss:$16 sps:$4 sm:$0xff]   ;;  %v1087_v28 = vld [vmem:[%s1612_s1] ss:$0 sm:$0xff]  ;;  %v1088_v32 = vld [vmem:[%s1612_s1 + $0x1] ss:$0 sm:$0xff] }
  0x14   : > { %s1629_s16 = smov (!%p214_p6, %s1083_s16), 31  ;;  %478 = vmatpush1.bf16.msra.mxu0 %v1203_v11  ;;  %531 = vmatpush1.bf16.msra.mxu1 %v1204_v12  ;;  %v1227_v35 = vld [vmem:[%s1613_s2 + $0xc0] ss:$16 sps:$4 sm:$0xff]   ;;  %v1228_v36 = vld [vmem:[%s1613_s2 + $0xc8] ss:$16 sps:$4 sm:$0xff]   ;;  %v299_v60 = vsub.s32 1, %v1456_v56 }
  0x15   : > { %479 = vmatprep.subr.bf16.mxu0 %v1205_v13  ;;  %532 = vmatprep.subr.bf16.mxu1 %v1207_v14  ;;  %s1084_s5 = sshll.u32 %s1629_s16, 2  ;;  %v1229_v39 = vld [vmem:[%s1613_s2 + $0xe4] ss:$16 sps:$4 sm:$0xff]   ;;  %v1231_v40 = vld [vmem:[%s1613_s2 + $0xec] ss:$16 sps:$4 sm:$0xff]   ;;  %v307_v61 = vsub.s32 3, %v1456_v56 }
  0x16   : > { %s217_s12 = scalar_lea.vmem %s1611_s0, %s1084_s5  ;;  %v1233_v45 = vld [vmem:[%s1613_s2 + $0xe0] ss:$16 sps:$4 sm:$0xff]   ;;  %v1234_v46 = vld [vmem:[%s1613_s2 + $0xe8] ss:$16 sps:$4 sm:$0xff]   ;;  %p1121_p7 = scmp.ne.s32.totalorder %s1257_s15, 0 }
  0x17   : > { %v1136_v27 = vld [vmem:[%s217_s12] sm:$0xff]   ;;  %v1143_v31 = vld [vmem:[%s217_s12 + $0x8] sm:$0xff]   ;;  %vm774_vm0 = vcmp.lt.s32.totalorder (!%p1121_p7), %v293_v55, 512 }
  0x18   : > { %480 = vmatpush1.bf16.msra.mxu0 %v1209_v15  ;;  %533 = vmatpush1.bf16.msra.mxu1 %v1210_v16  ;;  %v1137_v29 = vunpack.c.l.bf16 %v1136_v27  ;;  %v1138_v30 = vunpack.c.h.bf16 %v1136_v27  ;;  %v1141_v33 = vunpack.c.l.bf16 %v1143_v31  ;;  %v1142_v34 = vunpack.c.h.bf16 %v1143_v31  ;;  %v291_v59 = vld [vmem:[%s1614_s3] ss:$4 sm:$0xf] }
  0x19   : > { %481 = vmatprep.subr.bf16.mxu0 %v1211_v17  ;;  %534 = vmatprep.subr.bf16.mxu1 %v1213_v18  ;;  %v1465_v62 = vrot.slane %v291_v59, %v295_v57  ;;  %v1467_v63 = vrot.slane %v291_v59, %v303_v58  ;;  %v1469_v0 = vrot.slane %v291_v59, %v299_v60 }
  0x1a   : > { %v240_v37 = vmul.f32 %v1137_v29, %v1087_v28  ;;  %v241_v38 = vmul.f32 %v1138_v30, %v1087_v28  ;;  %v242_v43 = vmul.f32 %v1141_v33, %v1087_v28  ;;  %v243_v44 = vmul.f32 %v1142_v34, %v1087_v28 }
  0x1b   : > { %v1471_v1 = vrot.slane %v291_v59, %v307_v61 }
  0x1c   : > { %482 = vmatpush1.bf16.msra.mxu0 %v1215_v19  ;;  %535 = vmatpush1.bf16.msra.mxu1 %v1216_v20  ;;  %v249_v41 = vadd.f32 %v1088_v32, %v240_v37  ;;  %v250_v42 = vadd.f32 %v1088_v32, %v241_v38  ;;  %v251_v50 = vadd.f32 %v1088_v32, %v242_v43 }
  0x1d   : > { %483 = vmatprep.subr.bf16.mxu0 %v1217_v21  ;;  %536 = vmatprep.subr.bf16.mxu1 %v1219_v22  ;;  %v252_v51 = vadd.f32 %v1088_v32, %v243_v44 }
  0x1e   : > { %v253_v47 = vmax.f32 %v249_v41, 0.0  ;;  %v254_v48 = vmax.f32 %v250_v42, 0.0  ;;  %v255_v52 = vmax.f32 %v251_v50, 0.0 }
  0x1f   : > { %v256_v53 = vmax.f32 %v252_v51, 0.0 }
  0x20   : > { %484 = vmatpush1.bf16.msra.mxu0 %v1221_v23  ;;  %537 = vmatpush1.bf16.msra.mxu1 %v1222_v24  ;;  %v257_v49 = vpack.c.bf16 %v254_v48, %v253_v47 }
  0x21   : > { %485 = vmatprep.subr.bf16.mxu0 %v1223_v25  ;;  %538 = vmatprep.subr.bf16.mxu1 %v1225_v26  ;;  %v258_v54 = vpack.c.bf16 %v256_v53, %v255_v52 }
  0x24   : > { %486 = vmatpush1.bf16.msra.mxu0 %v1227_v35  ;;  %539 = vmatpush1.bf16.msra.mxu1 %v1228_v36 }
  0x25   : > { %487 = vmatprep.subr.bf16.mxu0 %v1229_v39  ;;  %540 = vmatprep.subr.bf16.mxu1 %v1231_v40 }
  0x28   : > { %488 = vmatpush1.bf16.msra.mxu0 %v1233_v45  ;;  %541 = vmatpush1.bf16.msra.mxu1 %v1234_v46 }
  0x2b   : > { %506 = vmatmul.mubr.bf16.vlgmr.msra.gmra.mrb[0].mxu0 %v257_v49  ;;  %559 = vmatmul.mubr.bf16.vlgmr.msra.gmra.mrb[0].mxu1 %v257_v49 }
  0x2c   : > { %515 = vmatprep.mubr.bf16.mxu0 %v1275_v2  ;;  %568 = vmatprep.mubr.bf16.mxu1 %v1275_v2 }
  0x33   : > { %516 = vmatmul.mubr.bf16.gmra.mrb[4].mxu0 %v258_v54  ;;  %569 = vmatmul.mubr.bf16.gmra.mrb[4].mxu1 %v258_v54 }
  0xfe   : > { %v507_v2 = vpop.f32.mrb[0].mxu0  ;;  %v560_v3 = vpop.f32.mrb[0].mxu1 }
  0xff   : > { %v508_v4 = vadd.f32 %v507_v2, %v1465_v62  ;;  %v561_v5 = vadd.f32 %v560_v3, %v1467_v63  ;;  %v509_v6 = vpop.f32.mrb[1].mxu0  ;;  %v562_v7 = vpop.f32.mrb[1].mxu1 }
 0x100   : > { %v510_v8 = vadd.f32 %v509_v6, %v1469_v0  ;;  %v1477_v9 = vadd.f32 %v562_v7, %v1471_v1  ;;  %v511_v10 = vpop.f32.mrb[2].mxu0  ;;  %v564_v11 = vpop.f32.mrb[2].mxu1 }
 0x101   : > { %v615_v12 = vmul.f32 %v508_v4, %v508_v4  ;;  %v617_v13 = vmul.f32 %v561_v5, %v561_v5  ;;  %v512_v14 = vadd.f32 %v511_v10, %v1465_v62  ;;  %v565_v15 = vadd.f32 %v564_v11, %v1467_v63  ;;  %v513_v16 = vpop.f32.mrb[3].mxu0  ;;  %v566_v17 = vpop.f32.mrb[3].mxu1 }
 0x102   : > { %v616_v18 = vmul.f32 %v510_v8, %v510_v8  ;;  %v618_v19 = vmul.f32 %v1477_v9, %v1477_v9  ;;  %v514_v20 = vadd.f32 %v513_v16, %v1469_v0  ;;  %v567_v21 = vadd.f32 %v566_v17, %v1471_v1 }
 0x103   : > { %v579_v22 = vadd.f32 %v512_v14, %v508_v4  ;;  %v619_v23 = vmul.f32 %v512_v14, %v512_v14  ;;  %v667_v24 = vmax.f32 %v508_v4, %v512_v14  ;;  %v703_v25 = vmin.f32 %v508_v4, %v512_v14 }
 0x104   : > { %v597_v26 = vadd.f32 %v565_v15, %v561_v5  ;;  %v621_v27 = vmul.f32 %v565_v15, %v565_v15  ;;  %v685_v28 = vmax.f32 %v561_v5, %v565_v15  ;;  %v721_v29 = vmin.f32 %v561_v5, %v565_v15 }
 0x105   : > { %v631_v30 = vadd.f32 %v619_v23, %v615_v12  ;;  %v588_v31 = vadd.f32 %v514_v20, %v510_v8  ;;  %v620_v32 = vmul.f32 %v514_v20, %v514_v20  ;;  %v676_v33 = vmax.f32 %v510_v8, %v514_v20 }
 0x106   : > { %v649_v34 = vadd.f32 %v621_v27, %v617_v13  ;;  %v712_v35 = vmin.f32 %v510_v8, %v514_v20  ;;  %v606_v36 = vadd.f32 %v567_v21, %v1477_v9  ;;  %v622_v37 = vmul.f32 %v567_v21, %v567_v21  ;;  %v517_v38 = vpop.f32.mrb[4].mxu0  ;;  %v570_v39 = vpop.f32.mrb[4].mxu1 }
 0x107   : > { %v640_v40 = vadd.f32 %v620_v32, %v616_v18  ;;  %v694_v41 = vmax.f32 %v1477_v9, %v567_v21  ;;  %v730_v42 = vmin.f32 %v1477_v9, %v567_v21  ;;  %v518_v43 = vadd.f32 %v517_v38, %v1465_v62  ;;  %v519_v44 = vpop.f32.mrb[5].mxu0  ;;  %v572_v45 = vpop.f32.mrb[5].mxu1 }
 0x108   : > { %v658_v46 = vadd.f32 %v622_v37, %v618_v19  ;;  %v571_v47 = vadd.f32 %v570_v39, %v1467_v63  ;;  %v520_v48 = vadd.f32 %v519_v44, %v1469_v0  ;;  %v573_v49 = vadd.f32 %v572_v45, %v1471_v1  ;;  %v521_v50 = vpop.f32.mrb[6].mxu0  ;;  %v574_v51 = vpop.f32.mrb[6].mxu1 }
 0x109   : > { %v580_v52 = vadd.f32 %v579_v22, %v518_v43  ;;  %v623_v53 = vmul.f32 %v518_v43, %v518_v43  ;;  %v668_v54 = vmax.f32 %v667_v24, %v518_v43  ;;  %v704_v57 = vmin.f32 %v703_v25, %v518_v43  ;;  %v523_v58 = vpop.f32.mrb[7].mxu0  ;;  %v576_v59 = vpop.f32.mrb[7].mxu1 }
 0x10a   : > { %v598_v60 = vadd.f32 %v597_v26, %v571_v47  ;;  %v625_v61 = vmul.f32 %v571_v47, %v571_v47  ;;  %v686_v2 = vmax.f32 %v685_v28, %v571_v47  ;;  %v722_v3 = vmin.f32 %v721_v29, %v571_v47 }
 0x10b   : > { %v632_v4 = vadd.f32 %v631_v30, %v623_v53  ;;  %v1492_v5 = vadd.f32 %v588_v31, %v520_v48  ;;  %v624_v6 = vmul.f32 %v520_v48, %v520_v48  ;;  %v1494_v7 = vmax.f32 %v676_v33, %v520_v48 }
 0x10c   : > { %v650_v8 = vadd.f32 %v649_v34, %v625_v61  ;;  %v1496_v9 = vmin.f32 %v712_v35, %v520_v48  ;;  %v1498_v10 = vadd.f32 %v606_v36, %v573_v49  ;;  %v626_v11 = vmul.f32 %v573_v49, %v573_v49 }
 0x10d   : > { %v1500_v12 = vadd.f32 %v640_v40, %v624_v6  ;;  %v1502_v13 = vmax.f32 %v694_v41, %v573_v49  ;;  %v1504_v14 = vmin.f32 %v730_v42, %v573_v49  ;;  %v522_v15 = vadd.f32 %v521_v50, %v1465_v62 }
 0x10e   : > { %v1507_v16 = vadd.f32 %v658_v46, %v626_v11  ;;  %v575_v17 = vadd.f32 %v574_v51, %v1467_v63  ;;  %v1511_v18 = vadd.f32 %v523_v58, %v1469_v0  ;;  %v1514_v19 = vadd.f32 %v576_v59, %v1471_v1 }
 0x10f   : > { %v581_v20 = vadd.f32 %v580_v52, %v522_v15  ;;  %v627_v21 = vmul.f32 %v522_v15, %v522_v15  ;;  %v669_v22 = vmax.f32 %v668_v54, %v522_v15  ;;  %v705_v23 = vmin.f32 %v704_v57, %v522_v15 }
 0x110   : > { %v599_v24 = vadd.f32 %v598_v60, %v575_v17  ;;  %v629_v25 = vmul.f32 %v575_v17, %v575_v17  ;;  %v687_v26 = vmax.f32 %v686_v2, %v575_v17  ;;  %v723_v27 = vmin.f32 %v722_v3, %v575_v17 }
 0x111   : > { %v582_v28 = vrot.slane %v581_v20, 4  ;;  %v633_v62 = vadd.f32 %v632_v4, %v627_v21  ;;  %v670_v29 = vrot.slane %v669_v22, 4  ;;  %v706_v30 = vrot.slane %v705_v23, 4 }
 0x112   : > { %v600_v31 = vrot.slane %v599_v24, 4  ;;  %v651_v63 = vadd.f32 %v650_v8, %v629_v25  ;;  %v688_v32 = vrot.slane %v687_v26, 4  ;;  %v724_v0 = vrot.slane %v723_v27, 4 }
 0x113   : > { %v583_v33 = vadd.f32 %v582_v28, %v581_v20  ;;  %v634_v34 = vrot.slane %v633_v62, 4  ;;  %v671_v1 = vmax.f32 %v669_v22, %v670_v29  ;;  %v707_v35 = vmin.f32 %v705_v23, %v706_v30 }
 0x114   : > { %v601_v36 = vadd.f32 %v600_v31, %v599_v24  ;;  %v652_v37 = vrot.slane %v651_v63, 4  ;;  %v689_v38 = vmax.f32 %v687_v26, %v688_v32  ;;  %v725_v39 = vmin.f32 %v723_v27, %v724_v0 }
 0x115   : > { %v584_v40 = vrot.slane %v583_v33, 2  ;;  %v635_v41 = vadd.f32 %v634_v34, %v633_v62  ;;  %v672_v42 = vrot.slane %v671_v1, 2  ;;  %v708_v43 = vrot.slane %v707_v35, 2 }
 0x116   : > { %v602_v44 = vrot.slane %v601_v36, 2  ;;  %v653_v45 = vadd.f32 %v652_v37, %v651_v63  ;;  %v690_v46 = vrot.slane %v689_v38, 2  ;;  %v726_v47 = vrot.slane %v725_v39, 2 }
 0x117   : > { %v585_v48 = vadd.f32 %v584_v40, %v583_v33  ;;  %v636_v49 = vrot.slane %v635_v41, 2  ;;  %v673_v50 = vmax.f32 %v671_v1, %v672_v42  ;;  %v709_v51 = vmin.f32 %v707_v35, %v708_v43 }
 0x118   : > { %v603_v52 = vadd.f32 %v602_v44, %v601_v36  ;;  %v654_v53 = vrot.slane %v653_v45, 2  ;;  %v691_v54 = vmax.f32 %v689_v38, %v690_v46  ;;  %v727_v57 = vmin.f32 %v725_v39, %v726_v47 }
 0x119   : > { %v586_v58 = vrot.slane %v585_v48, 1  ;;  %v637_v59 = vadd.f32 %v636_v49, %v635_v41  ;;  %v674_v60 = vrot.slane %v673_v50, 1  ;;  %v710_v61 = vrot.slane %v709_v51, 1 }
 0x11a   : > { %v604_v2 = vrot.slane %v603_v52, 1  ;;  %v655_v3 = vadd.f32 %v654_v53, %v653_v45  ;;  %v692_v4 = vrot.slane %v691_v54, 1  ;;  %v728_v6 = vrot.slane %v727_v57, 1 }
 0x11b   : > { %v1516_v8 = vadd.f32 %v586_v58, %v585_v48  ;;  %v638_v11 = vrot.slane %v637_v59, 1  ;;  %v1518_v15 = vmax.f32 %v673_v50, %v674_v60  ;;  %v1520_v17 = vmin.f32 %v709_v51, %v710_v61 }
 0x11c   : > { %v1522_v20 = vadd.f32 %v604_v2, %v603_v52  ;;  %v656_v21 = vrot.slane %v655_v3, 1  ;;  %v1524_v22 = vmax.f32 %v691_v54, %v692_v4  ;;  %v1526_v23 = vmin.f32 %v727_v57, %v728_v6 }
 0x11d   : > { %v1528_v24 = vadd.f32 %v638_v11, %v637_v59  ;;  %v590_v25 = vadd.f32 %v1492_v5, %v1511_v18  ;;  %v628_v26 = vmul.f32 %v1511_v18, %v1511_v18  ;;  %v678_v27 = vmax.f32 %v1494_v7, %v1511_v18 }
 0x11e   : > { %v1536_v28 = vadd.f32 %v656_v21, %v655_v3  ;;  %v714_v62 = vmin.f32 %v1496_v9, %v1511_v18  ;;  %v608_v29 = vadd.f32 %v1498_v10, %v1514_v19  ;;  %v630_v30 = vmul.f32 %v1514_v19, %v1514_v19 }
 0x11f   : > { %v591_v31 = vrot.slane %v590_v25, 4  ;;  %v642_v5 = vadd.f32 %v1500_v12, %v628_v26  ;;  %v679_v63 = vrot.slane %v678_v27, 4  ;;  %v696_v32 = vmax.f32 %v1502_v13, %v1514_v19 }
 0x120   : > { %v715_v0 = vrot.slane %v714_v62, 4  ;;  %v609_v7 = vrot.slane %v608_v29, 4  ;;  %v660_v33 = vadd.f32 %v1507_v16, %v630_v30  ;;  %v732_v9 = vmin.f32 %v1504_v14, %v1514_v19 }
 0x121   : > { %v592_v18 = vadd.f32 %v591_v31, %v590_v25  ;;  %v643_v34 = vrot.slane %v642_v5, 4  ;;  %v680_v10 = vmax.f32 %v678_v27, %v679_v63  ;;  %v697_v1 = vrot.slane %v696_v32, 4 }
 0x122   : > { %v716_v35 = vmin.f32 %v714_v62, %v715_v0  ;;  %v610_v36 = vadd.f32 %v609_v7, %v608_v29  ;;  %v661_v37 = vrot.slane %v660_v33, 4  ;;  %v733_v38 = vrot.slane %v732_v9, 4 }
 0x123   : > { %v593_v12 = vrot.slane %v592_v18, 2  ;;  %v644_v39 = vadd.f32 %v643_v34, %v642_v5  ;;  %v681_v40 = vrot.slane %v680_v10, 2  ;;  %v698_v41 = vmax.f32 %v696_v32, %v697_v1 }
 0x124   : > { %v717_v13 = vrot.slane %v716_v35, 2  ;;  %v611_v42 = vrot.slane %v610_v36, 2  ;;  %v662_v43 = vadd.f32 %v661_v37, %v660_v33  ;;  %v734_v44 = vmin.f32 %v732_v9, %v733_v38 }
 0x125   : > { %v594_v16 = vadd.f32 %v593_v12, %v592_v18  ;;  %v645_v45 = vrot.slane %v644_v39, 2  ;;  %v682_v46 = vmax.f32 %v680_v10, %v681_v40  ;;  %v699_v14 = vrot.slane %v698_v41, 2 }
 0x126   : > { %v718_v19 = vmin.f32 %v716_v35, %v717_v13  ;;  %v612_v47 = vadd.f32 %v611_v42, %v610_v36  ;;  %v663_v48 = vrot.slane %v662_v43, 2  ;;  %v735_v49 = vrot.slane %v734_v44, 2  ;;  %742 = sbr.rel (%p1121_p7) target bundleno = 314 (0x13a), region = 40 }
 0x127   : > { %v595_v50 = vrot.slane %v594_v16, 1  ;;  %v646_v51 = vadd.f32 %v645_v45, %v644_v39  ;;  %v683_v52 = vrot.slane %v682_v46, 1  ;;  %v700_v53 = vmax.f32 %v698_v41, %v699_v14 }
 0x128   : > { %v719_v54 = vrot.slane %v718_v19, 1  ;;  %v613_v57 = vrot.slane %v612_v47, 1  ;;  %v664_v58 = vadd.f32 %v663_v48, %v662_v43  ;;  %v736_v59 = vmin.f32 %v734_v44, %v735_v49 }
 0x129   : > { %v1550_v60 = vadd.f32 %v595_v50, %v594_v16  ;;  %v647_v61 = vrot.slane %v646_v51, 1  ;;  %v1552_v2 = vmax.f32 %v682_v46, %v683_v52  ;;  %v701_v3 = vrot.slane %v700_v53, 1 }
 0x12a   : > { %v1554_v4 = vmin.f32 %v718_v19, %v719_v54  ;;  %v614_v6 = vadd.f32 %v613_v57, %v612_v47  ;;  %v665_v11 = vrot.slane %v664_v58, 1  ;;  %v737_v21 = vrot.slane %v736_v59, 1 }
 0x12b   : > { %v648_v25 = vadd.f32 %v647_v61, %v646_v51  ;;  %v702_v26 = vmax.f32 %v700_v53, %v701_v3  ;;  %v1276_v29 = vmov (!%p1121_p7), 1966171168   ;;  %v747_v31 = vcombine.low (!%p1121_p7), %v1516_v8, %v1550_v60 }
 0x12c   : > { %v666_v27 = vadd.f32 %v665_v11, %v664_v58  ;;  %v738_v62 = vmin.f32 %v736_v59, %v737_v21  ;;  %v750_v30 = vunpack.c.l.s4 (!%p1121_p7), %v1276_v29  ;;  %v748_v5 = vcombine.low (!%p1121_p7), %v1522_v20, %v614_v6 }
 0x12d   : > { %v781_v32 = vcombine.low %v1528_v24, %v648_v25  ;;  %v812_v7 = vcombine.low %v1518_v15, %v1552_v2  ;;  %v813_v33 = vcombine.low %v1524_v22, %v702_v26  ;;  %v843_v9 = vcombine.low %v1520_v17, %v1554_v4 }
 0x12e   : > { %v751_v63 = vunpack.c.0.s8 %v750_v30  ;;  %v782_v0 = vcombine.low %v1536_v28, %v666_v27  ;;  %v844_v18 = vcombine.low %v1526_v23, %v738_v62 }
 0x130   : > { %v754_v34 = vsub.s32 %v751_v63, %v1456_v56 }
 0x132   : > { %v755_v10 = vrot.slane %v747_v31, %v754_v34  ;;  %v762_v1 = vrot.slane %v748_v5, %v754_v34  ;;  %v789_v35 = vrot.slane %v781_v32, %v754_v34  ;;  %v796_v36 = vrot.slane %v782_v0, %v754_v34 }
 0x133   : > { %v820_v37 = vrot.slane %v812_v7, %v754_v34  ;;  %v827_v38 = vrot.slane %v813_v33, %v754_v34  ;;  %v851_v12 = vrot.slane %v843_v9, %v754_v34  ;;  %v858_v39 = vrot.slane %v844_v18, %v754_v34 }
 0x134   : > { %v763_v40 = vcombine.low %v755_v10, %v762_v1  ;;  %v797_v41 = vcombine.low %v789_v35, %v796_v36 }
 0x135   : > { %v828_v13 = vcombine.low %v820_v37, %v827_v38  ;;  %v859_v42 = vcombine.low %v851_v12, %v858_v39 }
 0x136   : > { %v770_v43 = vrot.slane %v763_v40, %v754_v34  ;;  %v804_v44 = vrot.slane %v797_v41, %v754_v34 }
 0x137   : > { %v835_v16 = vrot.slane %v828_v13, %v754_v34  ;;  %v866_v45 = vrot.slane %v859_v42, %v754_v34 }
 0x138   : > { %776 = vst.msk [vmem:[%s1367_s22] ss:$4 sm:$0xf] %vm774_vm0, %v770_v43  ;;  %1122 = vst.msk [vmem:[%s1367_s22 + $0x1] ss:$4 sm:$0xf] %vm774_vm0, %v804_v44 }
 0x139   : > { %1123 = vst.msk [vmem:[%s1367_s22 + $0x2] ss:$4 sm:$0xf] %vm774_vm0, %v835_v16  ;;  %1124 = vst.msk [vmem:[%s1367_s22 + $0x3] ss:$4 sm:$0xf] %vm774_vm0, %v866_v45 }
 0x13a PF: > { %p1125_p8 = scmp.le.s32.totalorder %s1257_s15, 0 }
 0x13b   : > { %v1277_v46 = vmov (!%p1125_p8), 1966171168   ;;  %v879_v19 = vcombine.low (!%p1125_p8), %v1516_v8, %v1550_v60  ;;  %v880_v47 = vcombine.low (!%p1125_p8), %v1522_v20, %v614_v6  ;;  %v916_v49 = vcombine.low (!%p1125_p8), %v1528_v24, %v648_v25 }
 0x13c   : > { %873 = sbr.rel (%p1125_p8) target bundleno = 332 (0x14c), region = 44  ;;  %v882_v14 = vunpack.c.l.s4 (!%p1125_p8), %v1277_v46  ;;  %v917_v50 = vcombine.low (!%p1125_p8), %v1536_v28, %v666_v27  ;;  %v949_v51 = vcombine.low (!%p1125_p8), %v1518_v15, %v1552_v2  ;;  %v950_v52 = vcombine.low (!%p1125_p8), %v1524_v22, %v702_v26 }
 0x13d   : > { %v982_v53 = vcombine.low (!%p1125_p8), %v1520_v17, %v1554_v4  ;;  %v983_v54 = vcombine.low (!%p1125_p8), %v1526_v23, %v738_v62  ;;  %vm907_vm1 = vcmp.lt.s32.totalorder (!%p1125_p8), %v293_v55, 512 }
 0x13e   : > { %v883_v48 = vunpack.c.0.s8 (!%p1125_p8), %v882_v14 }
 0x13f   : > { %v874_v22 = vld [vmem:[%s1367_s22] ss:$4 sm:$0xf] (!%p1125_p8)  ;;  %v1126_v17 = vld [vmem:[%s1367_s22 + $0x1] ss:$4 sm:$0xf] (!%p1125_p8) }
 0x140   : > { %v886_v8 = vsub.s32 (!%p1125_p8), %v883_v48, %v1456_v56  ;;  %v1128_v6 = vld [vmem:[%s1367_s22 + $0x2] ss:$4 sm:$0xf] (!%p1125_p8)  ;;  %v1130_v11 = vld [vmem:[%s1367_s22 + $0x3] ss:$4 sm:$0xf] (!%p1125_p8) }
 0x142   : > { %v887_v20 = vrot.slane (!%p1125_p8), %v879_v19, %v886_v8  ;;  %v894_v57 = vrot.slane (!%p1125_p8), %v880_v47, %v886_v8  ;;  %v924_v24 = vrot.slane (!%p1125_p8), %v916_v49, %v886_v8  ;;  %v931_v28 = vrot.slane (!%p1125_p8), %v917_v50, %v886_v8 }
 0x143   : > { %v957_v58 = vrot.slane %v949_v51, %v886_v8  ;;  %v964_v59 = vrot.slane %v950_v52, %v886_v8  ;;  %v990_v60 = vrot.slane %v982_v53, %v886_v8  ;;  %v997_v15 = vrot.slane %v983_v54, %v886_v8 }
 0x144   : > { %v895_v61 = vcombine.low %v887_v20, %v894_v57  ;;  %v932_v2 = vcombine.low %v924_v24, %v931_v28 }
 0x145   : > { %v965_v23 = vcombine.low %v957_v58, %v964_v59  ;;  %v998_v56 = vcombine.low %v990_v60, %v997_v15 }
 0x146   : > { %v902_v3 = vrot.slane %v895_v61, %v886_v8  ;;  %v939_v4 = vrot.slane %v932_v2, %v886_v8 }
 0x147   : > { %v972_v21 = vrot.slane %v965_v23, %v886_v8  ;;  %v1005_v25 = vrot.slane %v998_v56, %v886_v8 }
 0x148   : > { %v904_v26 = vadd.f32 %v902_v3, %v874_v22  ;;  %v941_v27 = vadd.f32 %v1126_v17, %v939_v4 }
 0x149   : > { %v974_v62 = vmax.f32 %v1128_v6, %v972_v21  ;;  %v1007_v29 = vmin.f32 %v1130_v11, %v1005_v25 }
 0x14a   : > { %909 = vst.msk [vmem:[%s1367_s22] ss:$4 sm:$0xf] %vm907_vm1, %v904_v26  ;;  %1127 = vst.msk [vmem:[%s1367_s22 + $0x1] ss:$4 sm:$0xf] %vm907_vm1, %v941_v27 }
 0x14b   : > { %1129 = vst.msk [vmem:[%s1367_s22 + $0x2] ss:$4 sm:$0xf] %vm907_vm1, %v974_v62  ;;  %1131 = vst.msk [vmem:[%s1367_s22 + $0x3] ss:$4 sm:$0xf] %vm907_vm1, %v1007_v29 }
 0x14c PF: > { %s14_s19 = sadd.s32 1, %s1273_s19   ;;  %s1616_s15 = smov %s1265_s17 }
 0x14d   : > { %p11_p9 = scmp.ge.s32.totalorder %s14_s19, 10   ;;  %s1617_s16 = smov %s1269_s18 }
 0x14e   : > { %s1618_s17 = smov %s1621_s20  ;;  %s1619_s18 = smov %s1625_s21 }
 0x14f   :  { %13 = sbr.rel (!%p11_p9) target bundleno = 3 (0x3), region = 80 }

// kernel: simple_transformer.5
= control target key start
LH: loop header
LB: loop body
LE: loop exit
PB: predicated region body
PF: predicated region fallthrough
CT: control target
= control target key end

     0   :  { %v33_v36 = vlaneseq  ;;  %v1051_v37 = vmov 1983009808   ;;  %vm821_vm5 = vcmask 123904   ;;  %s1400_s3 = inlined_call_operand.vmem [shape: bf16[512,256], index: 3, kind: input, shape index: {}]   ;;  %s1401_s0 = inlined_call_operand.vmem [shape: f32[2,512], index: 0, kind: input, shape index: {}]   ;;  %s1402_s2 = inlined_call_operand.vmem [shape: f32[2,512], index: 2, kind: input, shape index: {}]   ;;  %s1403_s1 = inlined_call_operand.vmem [shape: f32[2,512], index: 1, kind: input, shape index: {}]   ;;  %s1404_s5 = inlined_call_operand.vmem [shape: bf16[256,16], index: 5, kind: input, shape index: {}]   ;;  %s1405_s4 = inlined_call_operand.vmem [shape: f32[1,256], index: 4, kind: input, shape index: {}]   ;;  %s1406_s6 = inlined_call_operand.vmem [shape: f32[1,16], index: 6, kind: input, shape index: {}]   ;;  %s1407_s7 = inlined_call_operand.vmem [shape: f32[2,16], index: 7, kind: output, shape index: {}]  }
   0x1   :  { %v937_v0 = vld [vmem:[%s1400_s3 + $0x4] ss:$8 sps:$4 sm:$0xff]   ;;  %v941_v2 = vld [vmem:[%s1400_s3] ss:$8 sps:$4 sm:$0xff]   ;;  %v943_v4 = vld [vmem:[%s1400_s3 + $0x14] ss:$8 sps:$4 sm:$0xff]   ;;  %v56_v38 = vunpack.c.l.s4 %v1051_v37 }
   0x2   :  { %v939_v1 = vld [vmem:[%s1400_s3 + $0x104] ss:$8 sps:$4 sm:$0xff]   ;;  %560 = vmatprep.subr.bf16.mxu1 %v937_v0  ;;  %v942_v3 = vld [vmem:[%s1400_s3 + $0x100] ss:$8 sps:$4 sm:$0xff]   ;;  %v945_v5 = vld [vmem:[%s1400_s3 + $0x114] ss:$8 sps:$4 sm:$0xff]  }
   0x3   :  { %601 = vmatprep.subr.bf16.mxu0 %v939_v1  ;;  %561 = vmatpush1.bf16.msra.mxu1 %v941_v2  ;;  %v947_v6 = vld [vmem:[%s1400_s3 + $0x10] ss:$8 sps:$4 sm:$0xff]   ;;  %v949_v8 = vld [vmem:[%s1400_s3 + $0x24] ss:$8 sps:$4 sm:$0xff]   ;;  %v953_v10 = vld [vmem:[%s1400_s3 + $0x20] ss:$8 sps:$4 sm:$0xff]   ;;  %v57_v43 = vunpack.c.0.s8 %v56_v38 }
   0x4   :  { %602 = vmatpush1.bf16.msra.mxu0 %v942_v3  ;;  %562 = vmatprep.subr.bf16.mxu1 %v943_v4  ;;  %v948_v7 = vld [vmem:[%s1400_s3 + $0x110] ss:$8 sps:$4 sm:$0xff]   ;;  %v951_v9 = vld [vmem:[%s1400_s3 + $0x124] ss:$8 sps:$4 sm:$0xff]   ;;  %v954_v11 = vld [vmem:[%s1400_s3 + $0x120] ss:$8 sps:$4 sm:$0xff]  }
   0x5   :  { %603 = vmatprep.subr.bf16.mxu0 %v945_v5  ;;  %v955_v12 = vld [vmem:[%s1400_s3 + $0x34] ss:$8 sps:$4 sm:$0xff]   ;;  %v959_v14 = vld [vmem:[%s1400_s3 + $0x30] ss:$8 sps:$4 sm:$0xff]   ;;  %v961_v16 = vld [vmem:[%s1400_s3 + $0x44] ss:$8 sps:$4 sm:$0xff]  }
   0x6   :  { %v957_v13 = vld [vmem:[%s1400_s3 + $0x134] ss:$8 sps:$4 sm:$0xff]   ;;  %v960_v15 = vld [vmem:[%s1400_s3 + $0x130] ss:$8 sps:$4 sm:$0xff]   ;;  %v963_v17 = vld [vmem:[%s1400_s3 + $0x144] ss:$8 sps:$4 sm:$0xff]  }
   0x7   :  { %563 = vmatpush1.bf16.msra.mxu1 %v947_v6  ;;  %v965_v18 = vld [vmem:[%s1400_s3 + $0x40] ss:$8 sps:$4 sm:$0xff]   ;;  %v967_v20 = vld [vmem:[%s1400_s3 + $0x54] ss:$8 sps:$4 sm:$0xff]   ;;  %v971_v22 = vld [vmem:[%s1400_s3 + $0x50] ss:$8 sps:$4 sm:$0xff]  }
   0x8   :  { %604 = vmatpush1.bf16.msra.mxu0 %v948_v7  ;;  %564 = vmatprep.subr.bf16.mxu1 %v949_v8  ;;  %v966_v19 = vld [vmem:[%s1400_s3 + $0x140] ss:$8 sps:$4 sm:$0xff]   ;;  %v969_v21 = vld [vmem:[%s1400_s3 + $0x154] ss:$8 sps:$4 sm:$0xff]   ;;  %v972_v23 = vld [vmem:[%s1400_s3 + $0x150] ss:$8 sps:$4 sm:$0xff]  }
   0x9   :  { %605 = vmatprep.subr.bf16.mxu0 %v951_v9  ;;  %v973_v24 = vld [vmem:[%s1400_s3 + $0x64] ss:$8 sps:$4 sm:$0xff]   ;;  %v977_v26 = vld [vmem:[%s1400_s3 + $0x60] ss:$8 sps:$4 sm:$0xff]   ;;  %v979_v28 = vld [vmem:[%s1400_s3 + $0x74] ss:$8 sps:$4 sm:$0xff]  }
   0xa   :  { %v975_v25 = vld [vmem:[%s1400_s3 + $0x164] ss:$8 sps:$4 sm:$0xff]   ;;  %v978_v27 = vld [vmem:[%s1400_s3 + $0x160] ss:$8 sps:$4 sm:$0xff]   ;;  %v981_v29 = vld [vmem:[%s1400_s3 + $0x174] ss:$8 sps:$4 sm:$0xff]  }
   0xb   :  { %565 = vmatpush1.bf16.msra.mxu1 %v953_v10  ;;  %v983_v30 = vld [vmem:[%s1400_s3 + $0x70] ss:$8 sps:$4 sm:$0xff]   ;;  %v985_v32 = vld [vmem:[%s1400_s3 + $0x84] ss:$8 sps:$4 sm:$0xff]   ;;  %v989_v34 = vld [vmem:[%s1400_s3 + $0x80] ss:$8 sps:$4 sm:$0xff]  }
   0xc   :  { %606 = vmatpush1.bf16.msra.mxu0 %v954_v11  ;;  %566 = vmatprep.subr.bf16.mxu1 %v955_v12  ;;  %v984_v31 = vld [vmem:[%s1400_s3 + $0x170] ss:$8 sps:$4 sm:$0xff]   ;;  %v987_v33 = vld [vmem:[%s1400_s3 + $0x184] ss:$8 sps:$4 sm:$0xff]   ;;  %v990_v35 = vld [vmem:[%s1400_s3 + $0x180] ss:$8 sps:$4 sm:$0xff]  }
   0xd   :  { %607 = vmatprep.subr.bf16.mxu0 %v957_v13  ;;  %v991_v39 = vld [vmem:[%s1400_s3 + $0x94] ss:$8 sps:$4 sm:$0xff]   ;;  %v995_v41 = vld [vmem:[%s1400_s3 + $0x90] ss:$8 sps:$4 sm:$0xff]   ;;  %v34_v42 = vshrl.u32 %v33_v36, 7  ;;  %v31_v57 = vld [vmem:[%s1401_s0] sm:$0xff] }
   0xe   :  { %v993_v40 = vld [vmem:[%s1400_s3 + $0x194] ss:$8 sps:$4 sm:$0xff]   ;;  %v996_v44 = vld [vmem:[%s1400_s3 + $0x190] ss:$8 sps:$4 sm:$0xff]   ;;  %v997_v45 = vld [vmem:[%s1400_s3 + $0xa4] ss:$8 sps:$4 sm:$0xff]   ;;  %v54_v0 = vcombine.high %v31_v57, %v31_v57 }
   0xf   :  { %567 = vmatpush1.bf16.msra.mxu1 %v959_v14  ;;  %v999_v46 = vld [vmem:[%s1400_s3 + $0x1a4] ss:$8 sps:$4 sm:$0xff]   ;;  %v1001_v47 = vld [vmem:[%s1400_s3 + $0xa0] ss:$8 sps:$4 sm:$0xff]   ;;  %v60_v49 = vsub.s32 %v57_v43, %v34_v42  ;;  %v1003_v50 = vld [vmem:[%s1400_s3 + $0xb4] ss:$8 sps:$4 sm:$0xff]  }
  0x10   :  { %608 = vmatpush1.bf16.msra.mxu0 %v960_v15  ;;  %568 = vmatprep.subr.bf16.mxu1 %v961_v16  ;;  %v1002_v48 = vld [vmem:[%s1400_s3 + $0x1a0] ss:$8 sps:$4 sm:$0xff]   ;;  %v1228_v51 = vsub.s32 1, %v34_v42  ;;  %v1230_v52 = vsub.s32 3, %v34_v42  ;;  %v1005_v53 = vld [vmem:[%s1400_s3 + $0x1b4] ss:$8 sps:$4 sm:$0xff]  }
  0x11   :  { %609 = vmatprep.subr.bf16.mxu0 %v963_v17  ;;  %v1235_v54 = vsub.s32 0, %v34_v42  ;;  %v1007_v55 = vld [vmem:[%s1400_s3 + $0xb0] ss:$8 sps:$4 sm:$0xff]   ;;  %v1246_v58 = vsub.s32 2, %v34_v42  ;;  %v1009_v59 = vld [vmem:[%s1400_s3 + $0xc4] ss:$8 sps:$4 sm:$0xff]   ;;  %v61_v63 = vrot.slane %v31_v57, %v60_v49  ;;  %v68_v9 = vrot.slane %v54_v0, %v60_v49 }
  0x12   :  { %v1008_v56 = vld [vmem:[%s1400_s3 + $0x1b0] ss:$8 sps:$4 sm:$0xff]   ;;  %v1011_v60 = vld [vmem:[%s1400_s3 + $0x1c4] ss:$8 sps:$4 sm:$0xff]   ;;  %v1052_v7 = vmov 0  }
  0x13   :  { %569 = vmatpush1.bf16.msra.mxu1 %v965_v18  ;;  %v27_v61 = vld [vmem:[%s1402_s2] ss:$2 sm:$0xf]  ;;  %v1260_v62 = vld [vmem:[%s1402_s2 + $0x1] ss:$2 sm:$0xf]  ;;  %v69_v5 = vcombine.high %v61_v63, %v61_v63 }
  0x14   :  { %610 = vmatpush1.bf16.msra.mxu0 %v966_v19  ;;  %570 = vmatprep.subr.bf16.mxu1 %v967_v20  ;;  %vm30_vm0 = vcmp.ge.f32.partialorder %v27_v61, 0.0  ;;  %v40_v1 = vrot.slane %v27_v61, %v1228_v51  ;;  %v79_v2 = vld [vmem:[%s1403_s1] sm:$0xff]  ;;  %v139_v3 = vrot.slane %v1260_v62, %v1228_v51  ;;  %v48_v4 = vrot.slane %v27_v61, %v1230_v52  ;;  %v1015_v16 = vld [vmem:[%s1400_s3 + $0xd4] ss:$8 sps:$4 sm:$0xff]   ;;  %v1032_v0 = vld [vmem:[%s1400_s3 + $0x1f0] ss:$8 sps:$4 sm:$0xff]  }
  0x15   :  { %611 = vmatprep.subr.bf16.mxu0 %v969_v21  ;;  %v88_v6 = vrot.slane %v79_v2, %v60_v49  ;;  %v106_v8 = vsel %vm30_vm0, 1, %v1052_v7  ;;  %v1013_v10 = vld [vmem:[%s1400_s3 + $0xc0] ss:$8 sps:$4 sm:$0xff]   ;;  %v81_v13 = vcombine.high %v79_v2, %v79_v2  ;;  %v147_v15 = vrot.slane %v1260_v62, %v1230_v52  ;;  %v1017_v21 = vld [vmem:[%s1400_s3 + $0x1d4] ss:$8 sps:$4 sm:$0xff]  }
  0x16   :  { %v1014_v11 = vld [vmem:[%s1400_s3 + $0x1c0] ss:$8 sps:$4 sm:$0xff]   ;;  %v114_v12 = vrot.slane %v106_v8, %v1228_v51  ;;  %v122_v14 = vrot.slane %v106_v8, %v1230_v52  ;;  %v76_v17 = vmul.f32 %v69_v5, %v40_v1  ;;  %v70_v19 = vcombine.high %v68_v9, %v68_v9  ;;  %v1029_v52 = vld [vmem:[%s1400_s3 + $0x1f4] ss:$8 sps:$4 sm:$0xff]  }
  0x17   :  { %571 = vmatpush1.bf16.msra.mxu1 %v971_v22  ;;  %v96_v18 = vcombine.high %v88_v6, %v88_v6  ;;  %v36_v20 = vrot.slane %v27_v61, %v1235_v54  ;;  %v44_v37 = vrot.slane %v27_v61, %v1246_v58  ;;  %v118_v38 = vrot.slane %v106_v8, %v1246_v58  ;;  %v1037_v5 = vld [vmem:[%s1404_s5 + $0x48] sm:$0xff]   ;;  %v1039_v7 = vld [vmem:[%s1404_s5 + $0x50] sm:$0xff]  }
  0x18   :  { %612 = vmatpush1.bf16.msra.mxu0 %v972_v23  ;;  %572 = vmatprep.subr.bf16.mxu1 %v973_v24  ;;  %vm1286_vm1 = vcmp.eq.s32.totalorder %v114_v12, 1  ;;  %v95_v23 = vrot.slane %v81_v13, %v60_v49  ;;  %vm1290_vm2 = vcmp.eq.s32.totalorder %v122_v14, 1  ;;  %v1044_v12 = vld [vmem:[%s1404_s5 + $0x20] sm:$0xff]   ;;  %v1045_v13 = vld [vmem:[%s1404_s5 + $0x68] sm:$0xff]  }
  0x19   :  { %613 = vmatprep.subr.bf16.mxu0 %v975_v25  ;;  %v110_v25 = vrot.slane %v106_v8, %v1235_v54  ;;  %vm125_vm4 = vcmp.eq.s32.totalorder %v118_v38, 1  ;;  %v1040_v8 = vld [vmem:[%s1404_s5 + $0x10] sm:$0xff]   ;;  %v1046_v14 = vld [vmem:[%s1404_s5 + $0x28] sm:$0xff]  }
  0x1b   :  { %573 = vmatpush1.bf16.msra.mxu1 %v977_v26  ;;  %v103_v26 = vmul.f32 %v96_v18, %v40_v1  ;;  %vm1301_vm3 = vcmp.eq.s32.totalorder %v110_v25, 1  ;;  %v1035_v1 = vld [vmem:[%s1404_s5 + $0x40] sm:$0xff]   ;;  %v1050_v18 = vld [vmem:[%s1404_s5 + $0x38] sm:$0xff]  }
  0x1c   :  { %614 = vmatpush1.bf16.msra.mxu0 %v978_v27  ;;  %574 = vmatprep.subr.bf16.mxu1 %v979_v28  ;;  %v78_v27 = vmul.f32 %v70_v19, %v48_v4  ;;  %v75_v28 = vmul.f32 %v61_v63, %v36_v20  ;;  %v1031_v63 = vld [vmem:[%s1400_s3 + $0xf0] ss:$8 sps:$4 sm:$0xff]   ;;  %v228_v19 = vld [vmem:[%s1405_s4] sm:$0x3] }
  0x1d   :  { %615 = vmatprep.subr.bf16.mxu0 %v981_v29  ;;  %v1019_v29 = vld [vmem:[%s1400_s3 + $0xd0] ss:$8 sps:$4 sm:$0xff]   ;;  %v128_v36 = vsel %vm1286_vm1, %v76_v17, %v103_v26 }
  0x1e   :  { %v1049_v17 = vld [vmem:[%s1404_s5 + $0x78] sm:$0xff]  }
  0x1f   :  { %575 = vmatpush1.bf16.msra.mxu1 %v983_v30  ;;  %v1020_v30 = vld [vmem:[%s1400_s3 + $0x1d0] ss:$8 sps:$4 sm:$0xff]  }
  0x20   :  { %616 = vmatpush1.bf16.msra.mxu0 %v984_v31  ;;  %576 = vmatprep.subr.bf16.mxu1 %v985_v32  ;;  %v97_v31 = vcombine.high %v95_v23, %v95_v23  ;;  %v102_v32 = vmul.f32 %v88_v6, %v36_v20  ;;  %v1038_v6 = vld [vmem:[%s1404_s5 + $0x8] sm:$0xff]   ;;  %v233_v20 = vrot.slane %v228_v19, %v1235_v54 }
  0x21   :  { %617 = vmatprep.subr.bf16.mxu0 %v987_v33 }
  0x22   :  { %v105_v42 = vmul.f32 %v97_v31, %v48_v4  ;;  %v127_v43 = vsel %vm1301_vm3, %v75_v28, %v102_v32  ;;  %v1036_v4 = vld [vmem:[%s1404_s5] sm:$0xff]  }
  0x23   :  { %577 = vmatpush1.bf16.msra.mxu1 %v989_v34  ;;  %v135_v34 = vrot.slane %v1260_v62, %v1235_v54 }
  0x24   :  { %618 = vmatpush1.bf16.msra.mxu0 %v990_v35  ;;  %578 = vmatprep.subr.bf16.mxu1 %v991_v39  ;;  %v1021_v35 = vld [vmem:[%s1400_s3 + $0xe4] ss:$8 sps:$4 sm:$0xff]   ;;  %v143_v39 = vrot.slane %v1260_v62, %v1246_v58  ;;  %v130_v49 = vsel %vm1290_vm2, %v78_v27, %v105_v42 }
  0x25   :  { %619 = vmatprep.subr.bf16.mxu0 %v993_v40  ;;  %v1023_v40 = vld [vmem:[%s1400_s3 + $0x1e4] ss:$8 sps:$4 sm:$0xff]  }
  0x27   :  { %579 = vmatpush1.bf16.msra.mxu1 %v995_v41  ;;  %v153_v41 = vadd.f32 %v139_v3, %v128_v36 }
  0x28   :  { %620 = vmatpush1.bf16.msra.mxu0 %v996_v44  ;;  %580 = vmatprep.subr.bf16.mxu1 %v997_v45  ;;  %v77_v44 = vmul.f32 %v68_v9, %v44_v37  ;;  %v104_v45 = vmul.f32 %v95_v23, %v44_v37  ;;  %v1041_v9 = vld [vmem:[%s1404_s5 + $0x58] sm:$0xff]  }
  0x29   :  { %621 = vmatprep.subr.bf16.mxu0 %v999_v46  ;;  %v1025_v46 = vld [vmem:[%s1400_s3 + $0xe0] ss:$8 sps:$4 sm:$0xff]  }
  0x2b   :  { %581 = vmatpush1.bf16.msra.mxu1 %v1001_v47  ;;  %v1026_v47 = vld [vmem:[%s1400_s3 + $0x1e0] ss:$8 sps:$4 sm:$0xff]  }
  0x2c   :  { %622 = vmatpush1.bf16.msra.mxu0 %v1002_v48  ;;  %582 = vmatprep.subr.bf16.mxu1 %v1003_v50  ;;  %v157_v48 = vmax.f32 %v153_v41, 0.0  ;;  %v1027_v50 = vld [vmem:[%s1400_s3 + $0xf4] ss:$8 sps:$4 sm:$0xff]  }
  0x2d   :  { %623 = vmatprep.subr.bf16.mxu0 %v1005_v53  ;;  %v155_v53 = vadd.f32 %v147_v15, %v130_v49  ;;  %v1047_v15 = vld [vmem:[%s1404_s5 + $0x70] sm:$0xff]  }
  0x2e   :  { %v161_v57 = vpack.c.bf16 %v157_v48, %v157_v48 }
  0x2f   :  { %583 = vmatpush1.bf16.msra.mxu1 %v1007_v55  ;;  %v152_v55 = vadd.f32 %v135_v34, %v127_v43 }
  0x30   :  { %624 = vmatpush1.bf16.msra.mxu0 %v1008_v56  ;;  %584 = vmatprep.subr.bf16.mxu1 %v1009_v59  ;;  %v129_v56 = vsel %vm125_vm4, %v77_v44, %v104_v45  ;;  %v159_v59 = vmax.f32 %v155_v53, 0.0 }
  0x31   :  { %625 = vmatprep.subr.bf16.mxu0 %v1011_v60  ;;  %v154_v58 = vadd.f32 %v143_v39, %v129_v56  ;;  %592 = vmatprep.mubr.bf16.mxu1 %v161_v57  ;;  %v156_v61 = vmax.f32 %v152_v55, 0.0 }
  0x32   :  { %v163_v60 = vpack.c.bf16 %v159_v59, %v159_v59 }
  0x33   :  { %585 = vmatpush1.bf16.msra.mxu1 %v1013_v10  ;;  %v158_v62 = vmax.f32 %v154_v58, 0.0  ;;  %v160_v2 = vpack.c.bf16 %v156_v61, %v156_v61  ;;  %v1042_v10 = vld [vmem:[%s1404_s5 + $0x18] sm:$0xff]  }
  0x34   :  { %626 = vmatpush1.bf16.msra.mxu0 %v1014_v11  ;;  %586 = vmatprep.subr.bf16.mxu1 %v1015_v16  ;;  %v1043_v11 = vld [vmem:[%s1404_s5 + $0x60] sm:$0xff]   ;;  %v1048_v16 = vld [vmem:[%s1404_s5 + $0x30] sm:$0xff]  }
  0x35   :  { %627 = vmatprep.subr.bf16.mxu0 %v1017_v21  ;;  %633 = vmatprep.mubr.bf16.mxu0 %v163_v60  ;;  %v162_v3 = vpack.c.bf16 %v158_v62, %v158_v62  ;;  %v237_v21 = vrot.slane %v228_v19, %v1228_v51  ;;  %v892_v51 = vld [vmem:[%s1406_s6] ss:$0 sm:$0xff] }
  0x37   :  { %587 = vmatpush1.bf16.msra.mxu1 %v1019_v29 }
  0x38   :  { %628 = vmatpush1.bf16.msra.mxu0 %v1020_v30  ;;  %588 = vmatprep.subr.bf16.mxu1 %v1021_v35 }
  0x39   :  { %629 = vmatprep.subr.bf16.mxu0 %v1023_v40 }
  0x3b   :  { %589 = vmatpush1.bf16.msra.mxu1 %v1025_v46 }
  0x3c   :  { %630 = vmatpush1.bf16.msra.mxu0 %v1026_v47  ;;  %590 = vmatprep.subr.bf16.mxu1 %v1027_v50 }
  0x3d   :  { %631 = vmatprep.subr.bf16.mxu0 %v1029_v52 }
  0x3f   :  { %591 = vmatpush1.bf16.msra.mxu1 %v1031_v63 }
  0x40   :  { %632 = vmatpush1.bf16.msra.mxu0 %v1032_v0  ;;  %909 = vmatprep.subr.bf16.mxu1 %v1035_v1 }
  0x42   :  { %593 = vmatmul.mubr.bf16.vlgmr.msra.gmra.mrb[0].mxu1 %v160_v2 }
  0x43   :  { %634 = vmatmul.mubr.bf16.vlgmr.msra.gmra.mrb[0].mxu0 %v162_v3  ;;  %910 = vmatpush3.bf16.msra.mxu1 %v1036_v4 }
  0x44   :  { %911 = vmatprep.subr.bf16.mxu1 %v1037_v5 }
  0x47   :  { %912 = vmatpush3.bf16.msra.mxu1 %v1038_v6 }
  0x48   :  { %913 = vmatprep.subr.bf16.mxu1 %v1039_v7 }
  0x4b   :  { %914 = vmatpush3.bf16.msra.mxu1 %v1040_v8 }
  0x4c   :  { %915 = vmatprep.subr.bf16.mxu1 %v1041_v9 }
  0x4f   :  { %916 = vmatpush3.bf16.msra.mxu1 %v1042_v10 }
  0x50   :  { %917 = vmatprep.subr.bf16.mxu1 %v1043_v11 }
  0x53   :  { %918 = vmatpush3.bf16.msra.mxu1 %v1044_v12 }
  0x54   :  { %919 = vmatprep.subr.bf16.mxu1 %v1045_v13 }
  0x57   :  { %920 = vmatpush3.bf16.msra.mxu1 %v1046_v14 }
  0x58   :  { %921 = vmatprep.subr.bf16.mxu1 %v1047_v15 }
  0x5b   :  { %922 = vmatpush3.bf16.msra.mxu1 %v1048_v16 }
  0x5c   :  { %923 = vmatprep.subr.bf16.mxu1 %v1049_v17 }
  0x5f   :  { %924 = vmatpush3.bf16.msra.mxu1 %v1050_v18 }
 0x115   :  { %v594_v22 = vpop.f32.mrb[0].mxu1 }
 0x116   :  { %v635_v23 = vpop.f32.mrb[0].mxu0  ;;  %v595_v24 = vadd.f32 %v594_v22, %v233_v20  ;;  %v596_v25 = vpop.f32.mrb[1].mxu1 }
 0x117   :  { %v637_v26 = vpop.f32.mrb[1].mxu0  ;;  %v597_v27 = vadd.f32 %v596_v25, %v237_v21  ;;  %v598_v28 = vpop.f32.mrb[2].mxu1 }
 0x118   :  { %v639_v29 = vpop.f32.mrb[2].mxu0  ;;  %v636_v30 = vadd.f32 %v635_v23, %v595_v24  ;;  %v599_v31 = vpop.f32.mrb[3].mxu1 }
 0x119   :  { %v640_v32 = vpop.f32.mrb[3].mxu0  ;;  %v638_v33 = vadd.f32 %v637_v26, %v597_v27 }
 0x11a   :  { %v642_v34 = vmax.f32 %v636_v30, 0.0 }
 0x11b   :  { %v643_v35 = vmax.f32 %v638_v33, 0.0 }
 0x11c   :  { %v644_v37 = vpack.c.bf16 %v642_v34, %v642_v34 }
 0x11d   :  { %v645_v36 = vpack.c.bf16 %v643_v35, %v643_v35 }
 0x11f   :  { %813 = vmatprep.mubr.bf16.mxu1 %v645_v36 }
 0x120   :  { %814 = vmatmul.mubr.bf16.vlgmr.msra.gmra.mrb[4].mxu1 %v644_v37 }
 0x1f3   :  { %v925_v54 = vpop.f32.mrb[4].mxu1 }
 0x1f4   :  { %v926_v38 = vpop.f32.mrb[5].mxu1 }
 0x1f5   :  { %v927_v39 = vadd.f32 %v926_v38, %v925_v54  ;;  %v928_v40 = vpop.f32.mrb[6].mxu1 }
 0x1f6   :  { %v929_v41 = vpop.f32.mrb[7].mxu1 }
 0x1f7   :  { %v816_v42 = vadd.f32 %v927_v39, %v892_v51 }
 0x1f9   :  { %822 = vst.msk [vmem:[%s1407_s7] sm:$0x3] %vm821_vm5, %v816_v42 }

</bundles_post_ra>
